<compile_context>
chip_gen: v7x
topology: tpu7x:2x2x1
jax: 0.10.0
libtpu: 0.0.40
codegen_flags: <defaults>
</compile_context>

<pallas_src>
import math

import jax
import jax.numpy as jnp
import numpy as np
from jax.experimental import pallas as pl
from jax.experimental.pallas import tpu as pltpu

KH = KW = 7
PAD = 3
EPS = 1e-5
LANES = 128


def _round_up(x, m):
    return (x + m - 1) // m * m


def _banded_weights(w_taps, W, c_in, c_out, c_in_pad):
    """Fold (kw, c_in) and the zero W-padding into a banded matrix [KH*W*c_in_pad, W*c_out].

    w_taps: [KH*KW, c_in, c_out] with tap index = kh*KW + kw.
    Row order (kh, w_in, c_in) matches the kernel's patch columns; column order (w_out, c_out)
    matches the lane-dense output slab.
    """
    w4 = w_taps.reshape(KH, KW, c_in, c_out)
    if c_in_pad != c_in:                                   # zero channels -> zero rows
        w4 = jnp.pad(w4, ((0, 0), (0, 0), (0, c_in_pad - c_in), (0, 0)))
    w_in = jnp.arange(W)[:, None]                          # [W, 1]
    w_out = jnp.arange(W)[None, :]                         # [1, W]
    kw = w_in - w_out + PAD                                # tap index for (w_in, w_out)
    valid = (kw >= 0) & (kw < KW)                          # band (= zero W-padding)
    kw_c = jnp.clip(kw, 0, KW - 1)
    band = w4[:, kw_c, :, :]                               # [KH, W(w_in), W(w_out), ci, co]
    band = band * valid[None, :, :, None, None].astype(w4.dtype)
    band = jnp.transpose(band, (0, 1, 3, 2, 4))            # [KH, w_in, ci, w_out, co]
    return band.reshape(KH * W * c_in_pad, W * c_out).astype(jnp.bfloat16)


def double_conv_1(x_nchw, params):
    """Forward pass matching the PyTorch module. Input/output are NCHW float32."""
    (w1, b1, g1, be1, w2, b2, g2, be2) = params            # b1/b2 unused: cancelled by BN
    N, Cin, H, W = x_nchw.shape
    C1 = w1.shape[-1]
    C2 = w2.shape[-1]
    assert C1 == C2, "module uses out_ch for both convs"
    C = C1
    assert (W * C) % LANES == 0, "kernel assumes W*out_ch is a multiple of 128"

    # Pad conv-1 input channels so the lane-dense slab width W*Cin_p is a multiple of 128.
    cmul = LANES // math.gcd(W, LANES)
    Cin_p = _round_up(Cin, cmul)

    # ---- layout prep (single XLA copy each way): NCHW -> lane-dense [N, H, W*Cin_p] slab ----
    x_nhwc = jnp.transpose(x_nchw, (0, 2, 3, 1)).astype(jnp.float32)
    if Cin_p != Cin:
        x_nhwc = jnp.pad(x_nhwc, ((0, 0), (0, 0), (0, 0), (0, Cin_p - Cin)))
    x_slab = x_nhwc.reshape(N, H, W * Cin_p)

    # Banded bf16 weights (one per conv), packed BN params, and the two tiny selector
    # matrices used for per-channel pooling / broadcast inside the kernel.
    wb1 = _banded_weights(w1, W, Cin, C, Cin_p)            # [KH*W*Cin_p, W*C]
    wb2 = _banded_weights(w2, W, C, C, C)                  # [KH*W*C,     W*C]
    bn = jnp.stack([g1.reshape(-1), be1.reshape(-1),
                    g2.reshape(-1), be2.reshape(-1)], axis=0).astype(jnp.float32)  # [4, C]
    eye = jnp.eye(C, dtype=jnp.float32)
    gsum = jnp.tile(eye, (W, 1))                           # [W*C, C]: pools the w-groups
    bcast = jnp.tile(eye, (1, W))                          # [C, W*C]: per-channel -> lanes

    inv_cnt = 1.0 / float(N * H * W)

    def kernel(x_ref, wb1_ref, wb2_ref, bn_ref, gsum_ref, bcast_ref, o_ref,
               xpad_ref, ypad_ref):
        # Zero ONLY the 3-row H halos (full lane width); W padding is in the banded weights.
        # (Single grid step here; guard with pl.when(program_id==0) if a grid is added.)
        zin = jnp.zeros((N, PAD, W * Cin_p), jnp.float32)
        xpad_ref[:, :PAD, :] = zin
        xpad_ref[:, PAD + H:, :] = zin
        xpad_ref[:, PAD:PAD + H, :] = x_ref[...]
        zmid = jnp.zeros((N, PAD, W * C), jnp.float32)
        ypad_ref[:, :PAD, :] = zmid
        ypad_ref[:, PAD + H:, :] = zmid

        def conv_bn_relu(pad_ref, wb_ref, g, beta):
            wc_in = pad_ref.shape[-1]
            # "im2col" over the 7 row shifts only -> single big-K bf16 MXU matmul.
            patches = jnp.concatenate(
                [pad_ref[:, kh:kh + H, :] for kh in range(KH)], axis=-1)  # [N, H, KH*W*c_in]
            patches = patches.reshape(N * H, KH * wc_in).astype(jnp.bfloat16)
            z = jnp.dot(patches, wb_ref[...],
                        preferred_element_type=jnp.float32)               # [N*H, W*C]

            # Training-mode BN over (N, H, W): single pass (sum & sum of squares), pooled
            # per channel and broadcast back to the (w, c) lanes via tiny selector matmuls.
            s1 = jnp.sum(z, axis=0, keepdims=True)                        # [1, W*C]
            s2 = jnp.sum(z * z, axis=0, keepdims=True)
            mean = jnp.dot(s1, gsum_ref[...],
                           preferred_element_type=jnp.float32) * inv_cnt  # [1, C]
            ex2 = jnp.dot(s2, gsum_ref[...],
                          preferred_element_type=jnp.float32) * inv_cnt
            var = ex2 - mean * mean                                       # biased variance
            scale = g * jax.lax.rsqrt(var + EPS)                          # gamma folded in
            shift = beta - mean * scale
            scale_t = jnp.dot(scale, bcast_ref[...],
                              preferred_element_type=jnp.float32)         # [1, W*C]
            shift_t = jnp.dot(shift, bcast_ref[...],
                              preferred_element_type=jnp.float32)
            return jnp.maximum(z * scale_t + shift_t, 0.0)                # [N*H, W*C] f32

        # conv1 -> BN1 -> ReLU, write the interior of the H-padded intermediate (full lanes).
        y1 = conv_bn_relu(xpad_ref, wb1_ref, bn_ref[0:1, :], bn_ref[1:2, :])
        ypad_ref[:, PAD:PAD + H, :] = y1.reshape(N, H, W * C)
        # conv2 -> BN2 -> ReLU, lane-dense output store.
        y2 = conv_bn_relu(ypad_ref, wb2_ref, bn_ref[2:3, :], bn_ref[3:4, :])
        o_ref[...] = y2

    vmem = pl.BlockSpec(memory_space=pltpu.MemorySpace.VMEM)
    out_slab = pl.pallas_call(
        kernel,
        out_shape=jax.ShapeDtypeStruct((N * H, W * C), jnp.float32),
        in_specs=[vmem] * 6,
        out_specs=vmem,
        scratch_shapes=[
            pltpu.VMEM((N, H + 2 * PAD, W * Cin_p), jnp.float32),  # H-padded input slab
            pltpu.VMEM((N, H + 2 * PAD, W * C), jnp.float32),      # H-padded intermediate
        ],
    )(x_slab, wb1, wb2, bn, gsum, bcast)

    # lane-dense slab -> PyTorch NCHW convention
    out = out_slab.reshape(N, H, W, C)
    return jnp.transpose(out, (0, 3, 1, 2))


def _reference(x_nchw, params):
    """Plain-JAX f32 reference with identical semantics (biases included; they cancel in BN)."""
    (w1, b1, g1, be1, w2, b2, g2, be2) = params

    def conv(x, w, b):
        w_hwio = w.reshape(KH, KW, w.shape[1], w.shape[2])
        y = jax.lax.conv_general_dilated(
            x, w_hwio, window_strides=(1, 1),
            padding=[(PAD, PAD), (PAD, PAD)],
            dimension_numbers=('NCHW', 'HWIO', 'NCHW'),
            preferred_element_type=jnp.float32)
        return y + b.reshape(1, -1, 1, 1)

    def bn_relu(z, g, beta):
        mean = jnp.mean(z, axis=(0, 2, 3), keepdims=True)
        var = jnp.mean((z - mean) ** 2, axis=(0, 2, 3), keepdims=True)
        zn = (z - mean) * jax.lax.rsqrt(var + EPS)
        return jnp.maximum(zn * g.reshape(1, -1, 1, 1) + beta.reshape(1, -1, 1, 1), 0.0)

    h = bn_relu(conv(x_nchw, w1, b1), g1, be1)
    return bn_relu(conv(h, w2, b2), g2, be2)


if __name__ == "__main__":
    N, Cin, H, W = 2, 4, 16, 16      # small shapes consistent with the module
    C1 = C2 = 8                      # out_ch

    key = jax.random.PRNGKey(0)
    ks = jax.random.split(key, 9)
    x = jax.random.normal(ks[0], (N, Cin, H, W), jnp.float32)

    # Deterministic synthetic parameters (shapes implied by the module's __init__).
    w1 = 0.1 * jax.random.normal(ks[1], (KH * KW, Cin, C1), jnp.float32)
    b1 = 0.1 * jax.random.normal(ks[2], (1, C1), jnp.float32)
    g1 = 1.0 + 0.1 * jax.random.normal(ks[3], (1, C1), jnp.float32)
    be1 = 0.1 * jax.random.normal(ks[4], (1, C1), jnp.float32)
    w2 = 0.1 * jax.random.normal(ks[5], (KH * KW, C1, C2), jnp.float32)
    b2 = 0.1 * jax.random.normal(ks[6], (1, C2), jnp.float32)
    g2 = 1.0 + 0.1 * jax.random.normal(ks[7], (1, C2), jnp.float32)
    be2 = 0.1 * jax.random.normal(ks[8], (1, C2), jnp.float32)
    params = (w1, b1, g1, be1, w2, b2, g2, be2)

    out = jax.block_until_ready(double_conv_1(x, params))
    ref = jax.block_until_ready(_reference(x, params))
    np.testing.assert_allclose(np.asarray(out), np.asarray(ref), rtol=2e-2, atol=2e-2)
    print("KERNEL_OK")
</pallas_src>

<mosaic_0001>
module attributes {stable_mosaic.version = 11 : i64} {
  func.func @kernel(%arg0: memref<2x16x128xf32, #tpu.memory_space<vmem>>, %arg1: memref<896x128xbf16, #tpu.memory_space<vmem>>, %arg2: memref<896x128xbf16, #tpu.memory_space<vmem>>, %arg3: memref<4x8xf32, #tpu.memory_space<vmem>>, %arg4: memref<128x8xf32, #tpu.memory_space<vmem>>, %arg5: memref<8x128xf32, #tpu.memory_space<vmem>>, %arg6: memref<32x128xf32, #tpu.memory_space<vmem>>, %arg7: memref<2x22x128xf32, #tpu.memory_space<vmem>>, %arg8: memref<2x22x128xf32, #tpu.memory_space<vmem>>) attributes {dimension_semantics = [], scalar_prefetch = 0 : i64, scratch_operands = 2 : i64, tpu.core_type = #tpu.core_type<tc>} {
    %cst = arith.constant 0.000000e+00 : f32
    %0 = vector.broadcast %cst : f32 to vector<2x3x128xf32>
    %c0 = arith.constant 0 : index
    %c0_0 = arith.constant 0 : index
    %c0_1 = arith.constant 0 : index
    %1 = vector.load %arg7[%c0, %c0_0, %c0_1] : memref<2x22x128xf32, #tpu.memory_space<vmem>>, vector<2x3x128xf32>
    tpu.vector_store %arg7[%c0, %c0_0, %c0_1], %0 {strides = array<i32>} : memref<2x22x128xf32, #tpu.memory_space<vmem>>, vector<2x3x128xf32>,
    %c0_2 = arith.constant 0 : index
    %c19 = arith.constant 19 : index
    %c0_3 = arith.constant 0 : index
    %2 = vector.load %arg7[%c0_2, %c19, %c0_3] : memref<2x22x128xf32, #tpu.memory_space<vmem>>, vector<2x3x128xf32>
    tpu.vector_store %arg7[%c0_2, %c19, %c0_3], %0 {strides = array<i32>} : memref<2x22x128xf32, #tpu.memory_space<vmem>>, vector<2x3x128xf32>,
    %c0_4 = arith.constant 0 : index
    %c0_5 = arith.constant 0 : index
    %c0_6 = arith.constant 0 : index
    %3 = vector.load %arg0[%c0_4, %c0_5, %c0_6] : memref<2x16x128xf32, #tpu.memory_space<vmem>>, vector<2x16x128xf32>
    %c0_7 = arith.constant 0 : index
    %c3 = arith.constant 3 : index
    %c0_8 = arith.constant 0 : index
    %4 = vector.load %arg7[%c0_7, %c3, %c0_8] : memref<2x22x128xf32, #tpu.memory_space<vmem>>, vector<2x16x128xf32>
    tpu.vector_store %arg7[%c0_7, %c3, %c0_8], %3 {strides = array<i32>} : memref<2x22x128xf32, #tpu.memory_space<vmem>>, vector<2x16x128xf32>,
    %cst_9 = arith.constant 0.000000e+00 : f32
    %5 = vector.broadcast %cst_9 : f32 to vector<2x3x128xf32>
    %c0_10 = arith.constant 0 : index
    %c0_11 = arith.constant 0 : index
    %c0_12 = arith.constant 0 : index
    %6 = vector.load %arg8[%c0_10, %c0_11, %c0_12] : memref<2x22x128xf32, #tpu.memory_space<vmem>>, vector<2x3x128xf32>
    tpu.vector_store %arg8[%c0_10, %c0_11, %c0_12], %5 {strides = array<i32>} : memref<2x22x128xf32, #tpu.memory_space<vmem>>, vector<2x3x128xf32>,
    %c0_13 = arith.constant 0 : index
    %c19_14 = arith.constant 19 : index
    %c0_15 = arith.constant 0 : index
    %7 = vector.load %arg8[%c0_13, %c19_14, %c0_15] : memref<2x22x128xf32, #tpu.memory_space<vmem>>, vector<2x3x128xf32>
    tpu.vector_store %arg8[%c0_13, %c19_14, %c0_15], %5 {strides = array<i32>} : memref<2x22x128xf32, #tpu.memory_space<vmem>>, vector<2x3x128xf32>,
    %c0_16 = arith.constant 0 : index
    %c0_17 = arith.constant 0 : index
    %8 = vector.load %arg3[%c0_16, %c0_17] : memref<4x8xf32, #tpu.memory_space<vmem>>, vector<1x8xf32>
    %c1 = arith.constant 1 : index
    %c0_18 = arith.constant 0 : index
    %9 = vector.load %arg3[%c1, %c0_18] : memref<4x8xf32, #tpu.memory_space<vmem>>, vector<1x8xf32>
    %c0_19 = arith.constant 0 : index
    %c0_20 = arith.constant 0 : index
    %c0_21 = arith.constant 0 : index
    %10 = vector.load %arg7[%c0_19, %c0_20, %c0_21] : memref<2x22x128xf32, #tpu.memory_space<vmem>>, vector<2x16x128xf32>
    %c0_22 = arith.constant 0 : index
    %c1_23 = arith.constant 1 : index
    %c0_24 = arith.constant 0 : index
    %11 = vector.load %arg7[%c0_22, %c1_23, %c0_24] : memref<2x22x128xf32, #tpu.memory_space<vmem>>, vector<2x16x128xf32>
    %c0_25 = arith.constant 0 : index
    %c2 = arith.constant 2 : index
    %c0_26 = arith.constant 0 : index
    %12 = vector.load %arg7[%c0_25, %c2, %c0_26] : memref<2x22x128xf32, #tpu.memory_space<vmem>>, vector<2x16x128xf32>
    %c0_27 = arith.constant 0 : index
    %c3_28 = arith.constant 3 : index
    %c0_29 = arith.constant 0 : index
    %13 = vector.load %arg7[%c0_27, %c3_28, %c0_29] : memref<2x22x128xf32, #tpu.memory_space<vmem>>, vector<2x16x128xf32>
    %c0_30 = arith.constant 0 : index
    %c4 = arith.constant 4 : index
    %c0_31 = arith.constant 0 : index
    %14 = vector.load %arg7[%c0_30, %c4, %c0_31] : memref<2x22x128xf32, #tpu.memory_space<vmem>>, vector<2x16x128xf32>
    %c0_32 = arith.constant 0 : index
    %c5 = arith.constant 5 : index
    %c0_33 = arith.constant 0 : index
    %15 = vector.load %arg7[%c0_32, %c5, %c0_33] : memref<2x22x128xf32, #tpu.memory_space<vmem>>, vector<2x16x128xf32>
    %c0_34 = arith.constant 0 : index
    %c6 = arith.constant 6 : index
    %c0_35 = arith.constant 0 : index
    %16 = vector.load %arg7[%c0_34, %c6, %c0_35] : memref<2x22x128xf32, #tpu.memory_space<vmem>>, vector<2x16x128xf32>
    %17 = tpu.concatenate %10, %11, %12, %13, %14, %15, %16 in 2 : vector<2x16x128xf32>, vector<2x16x128xf32>, vector<2x16x128xf32>, vector<2x16x128xf32>, vector<2x16x128xf32>, vector<2x16x128xf32>, vector<2x16x128xf32> -> vector<2x16x896xf32>
    %18 = vector.shape_cast %17 : vector<2x16x896xf32> to vector<32x896xf32>
    %19 = arith.truncf %18 : vector<32x896xf32> to vector<32x896xbf16>
    %c0_36 = arith.constant 0 : index
    %c0_37 = arith.constant 0 : index
    %20 = vector.load %arg1[%c0_36, %c0_37] : memref<896x128xbf16, #tpu.memory_space<vmem>>, vector<896x128xbf16>
    %cst_38 = arith.constant dense<0.000000e+00> : vector<32x128xf32>
    %21 = tpu.matmul %19, %20, %cst_38 {dimension_numbers = #tpu.dot_dimension_numbers<[1], [0], [0], [1], [0, 0, 1, 1], [], []>} : vector<32x896xbf16>, vector<896x128xbf16>, vector<32x128xf32> -> vector<32x128xf32>
    %cst_39 = arith.constant dense<0.000000e+00> : vector<128xf32>
    %22 = vector.multi_reduction <add>, %21, %cst_39 [0] : vector<32x128xf32> to vector<128xf32>
    %23 = vector.shape_cast %22 : vector<128xf32> to vector<1x128xf32>
    %24 = arith.mulf %21, %21 : vector<32x128xf32>
    %cst_40 = arith.constant dense<0.000000e+00> : vector<128xf32>
    %25 = vector.multi_reduction <add>, %24, %cst_40 [0] : vector<32x128xf32> to vector<128xf32>
    %26 = vector.shape_cast %25 : vector<128xf32> to vector<1x128xf32>
    %c0_41 = arith.constant 0 : index
    %c0_42 = arith.constant 0 : index
    %27 = vector.load %arg4[%c0_41, %c0_42] : memref<128x8xf32, #tpu.memory_space<vmem>>, vector<128x8xf32>
    %cst_43 = arith.constant dense<0.000000e+00> : vector<1x8xf32>
    %28 = tpu.matmul %23, %27, %cst_43 {dimension_numbers = #tpu.dot_dimension_numbers<[1], [0], [0], [1], [0, 0, 1, 1], [], []>} : vector<1x128xf32>, vector<128x8xf32>, vector<1x8xf32> -> vector<1x8xf32>
    %cst_44 = arith.constant 0.001953125 : f32
    %29 = vector.broadcast %cst_44 : f32 to vector<1x8xf32>
    %30 = arith.mulf %28, %29 : vector<1x8xf32>
    %c0_45 = arith.constant 0 : index
    %c0_46 = arith.constant 0 : index
    %31 = vector.load %arg4[%c0_45, %c0_46] : memref<128x8xf32, #tpu.memory_space<vmem>>, vector<128x8xf32>
    %cst_47 = arith.constant dense<0.000000e+00> : vector<1x8xf32>
    %32 = tpu.matmul %26, %31, %cst_47 {dimension_numbers = #tpu.dot_dimension_numbers<[1], [0], [0], [1], [0, 0, 1, 1], [], []>} : vector<1x128xf32>, vector<128x8xf32>, vector<1x8xf32> -> vector<1x8xf32>
    %cst_48 = arith.constant 0.001953125 : f32
    %33 = vector.broadcast %cst_48 : f32 to vector<1x8xf32>
    %34 = arith.mulf %32, %33 : vector<1x8xf32>
    %35 = arith.mulf %30, %30 : vector<1x8xf32>
    %36 = arith.subf %34, %35 : vector<1x8xf32>
    %cst_49 = arith.constant 9.99999974E-6 : f32
    %37 = vector.broadcast %cst_49 : f32 to vector<1x8xf32>
    %38 = arith.addf %36, %37 : vector<1x8xf32>
    %39 = math.rsqrt %38 : vector<1x8xf32>
    %40 = arith.mulf %8, %39 : vector<1x8xf32>
    %41 = arith.mulf %30, %40 : vector<1x8xf32>
    %42 = arith.subf %9, %41 : vector<1x8xf32>
    %c0_50 = arith.constant 0 : index
    %c0_51 = arith.constant 0 : index
    %43 = vector.load %arg5[%c0_50, %c0_51] : memref<8x128xf32, #tpu.memory_space<vmem>>, vector<8x128xf32>
    %cst_52 = arith.constant dense<0.000000e+00> : vector<1x128xf32>
    %44 = tpu.matmul %40, %43, %cst_52 {dimension_numbers = #tpu.dot_dimension_numbers<[1], [0], [0], [1], [0, 0, 1, 1], [], []>} : vector<1x8xf32>, vector<8x128xf32>, vector<1x128xf32> -> vector<1x128xf32>
    %c0_53 = arith.constant 0 : index
    %c0_54 = arith.constant 0 : index
    %45 = vector.load %arg5[%c0_53, %c0_54] : memref<8x128xf32, #tpu.memory_space<vmem>>, vector<8x128xf32>
    %cst_55 = arith.constant dense<0.000000e+00> : vector<1x128xf32>
    %46 = tpu.matmul %42, %45, %cst_55 {dimension_numbers = #tpu.dot_dimension_numbers<[1], [0], [0], [1], [0, 0, 1, 1], [], []>} : vector<1x8xf32>, vector<8x128xf32>, vector<1x128xf32> -> vector<1x128xf32>
    %47 = vector.broadcast %44 : vector<1x128xf32> to vector<32x128xf32>
    %48 = arith.mulf %21, %47 : vector<32x128xf32>
    %49 = vector.broadcast %46 : vector<1x128xf32> to vector<32x128xf32>
    %50 = arith.addf %48, %49 : vector<32x128xf32>
    %cst_56 = arith.constant 0.000000e+00 : f32
    %51 = vector.broadcast %cst_56 : f32 to vector<32x128xf32>
    %52 = arith.maximumf %50, %51 : vector<32x128xf32>
    %53 = vector.shape_cast %52 : vector<32x128xf32> to vector<2x16x128xf32>
    %c0_57 = arith.constant 0 : index
    %c3_58 = arith.constant 3 : index
    %c0_59 = arith.constant 0 : index
    %54 = vector.load %arg8[%c0_57, %c3_58, %c0_59] : memref<2x22x128xf32, #tpu.memory_space<vmem>>, vector<2x16x128xf32>
    tpu.vector_store %arg8[%c0_57, %c3_58, %c0_59], %53 {strides = array<i32>} : memref<2x22x128xf32, #tpu.memory_space<vmem>>, vector<2x16x128xf32>,
    %c2_60 = arith.constant 2 : index
    %c0_61 = arith.constant 0 : index
    %55 = vector.load %arg3[%c2_60, %c0_61] : memref<4x8xf32, #tpu.memory_space<vmem>>, vector<1x8xf32>
    %c3_62 = arith.constant 3 : index
    %c0_63 = arith.constant 0 : index
    %56 = vector.load %arg3[%c3_62, %c0_63] : memref<4x8xf32, #tpu.memory_space<vmem>>, vector<1x8xf32>
    %c0_64 = arith.constant 0 : index
    %c0_65 = arith.constant 0 : index
    %c0_66 = arith.constant 0 : index
    %57 = vector.load %arg8[%c0_64, %c0_65, %c0_66] : memref<2x22x128xf32, #tpu.memory_space<vmem>>, vector<2x16x128xf32>
    %c0_67 = arith.constant 0 : index
    %c1_68 = arith.constant 1 : index
    %c0_69 = arith.constant 0 : index
    %58 = vector.load %arg8[%c0_67, %c1_68, %c0_69] : memref<2x22x128xf32, #tpu.memory_space<vmem>>, vector<2x16x128xf32>
    %c0_70 = arith.constant 0 : index
    %c2_71 = arith.constant 2 : index
    %c0_72 = arith.constant 0 : index
    %59 = vector.load %arg8[%c0_70, %c2_71, %c0_72] : memref<2x22x128xf32, #tpu.memory_space<vmem>>, vector<2x16x128xf32>
    %c0_73 = arith.constant 0 : index
    %c3_74 = arith.constant 3 : index
    %c0_75 = arith.constant 0 : index
    %60 = vector.load %arg8[%c0_73, %c3_74, %c0_75] : memref<2x22x128xf32, #tpu.memory_space<vmem>>, vector<2x16x128xf32>
    %c0_76 = arith.constant 0 : index
    %c4_77 = arith.constant 4 : index
    %c0_78 = arith.constant 0 : index
    %61 = vector.load %arg8[%c0_76, %c4_77, %c0_78] : memref<2x22x128xf32, #tpu.memory_space<vmem>>, vector<2x16x128xf32>
    %c0_79 = arith.constant 0 : index
    %c5_80 = arith.constant 5 : index
    %c0_81 = arith.constant 0 : index
    %62 = vector.load %arg8[%c0_79, %c5_80, %c0_81] : memref<2x22x128xf32, #tpu.memory_space<vmem>>, vector<2x16x128xf32>
    %c0_82 = arith.constant 0 : index
    %c6_83 = arith.constant 6 : index
    %c0_84 = arith.constant 0 : index
    %63 = vector.load %arg8[%c0_82, %c6_83, %c0_84] : memref<2x22x128xf32, #tpu.memory_space<vmem>>, vector<2x16x128xf32>
    %64 = tpu.concatenate %57, %58, %59, %60, %61, %62, %63 in 2 : vector<2x16x128xf32>, vector<2x16x128xf32>, vector<2x16x128xf32>, vector<2x16x128xf32>, vector<2x16x128xf32>, vector<2x16x128xf32>, vector<2x16x128xf32> -> vector<2x16x896xf32>
    %65 = vector.shape_cast %64 : vector<2x16x896xf32> to vector<32x896xf32>
    %66 = arith.truncf %65 : vector<32x896xf32> to vector<32x896xbf16>
    %c0_85 = arith.constant 0 : index
    %c0_86 = arith.constant 0 : index
    %67 = vector.load %arg2[%c0_85, %c0_86] : memref<896x128xbf16, #tpu.memory_space<vmem>>, vector<896x128xbf16>
    %cst_87 = arith.constant dense<0.000000e+00> : vector<32x128xf32>
    %68 = tpu.matmul %66, %67, %cst_87 {dimension_numbers = #tpu.dot_dimension_numbers<[1], [0], [0], [1], [0, 0, 1, 1], [], []>} : vector<32x896xbf16>, vector<896x128xbf16>, vector<32x128xf32> -> vector<32x128xf32>
    %cst_88 = arith.constant dense<0.000000e+00> : vector<128xf32>
    %69 = vector.multi_reduction <add>, %68, %cst_88 [0] : vector<32x128xf32> to vector<128xf32>
    %70 = vector.shape_cast %69 : vector<128xf32> to vector<1x128xf32>
    %71 = arith.mulf %68, %68 : vector<32x128xf32>
    %cst_89 = arith.constant dense<0.000000e+00> : vector<128xf32>
    %72 = vector.multi_reduction <add>, %71, %cst_89 [0] : vector<32x128xf32> to vector<128xf32>
    %73 = vector.shape_cast %72 : vector<128xf32> to vector<1x128xf32>
    %c0_90 = arith.constant 0 : index
    %c0_91 = arith.constant 0 : index
    %74 = vector.load %arg4[%c0_90, %c0_91] : memref<128x8xf32, #tpu.memory_space<vmem>>, vector<128x8xf32>
    %cst_92 = arith.constant dense<0.000000e+00> : vector<1x8xf32>
    %75 = tpu.matmul %70, %74, %cst_92 {dimension_numbers = #tpu.dot_dimension_numbers<[1], [0], [0], [1], [0, 0, 1, 1], [], []>} : vector<1x128xf32>, vector<128x8xf32>, vector<1x8xf32> -> vector<1x8xf32>
    %cst_93 = arith.constant 0.001953125 : f32
    %76 = vector.broadcast %cst_93 : f32 to vector<1x8xf32>
    %77 = arith.mulf %75, %76 : vector<1x8xf32>
    %c0_94 = arith.constant 0 : index
    %c0_95 = arith.constant 0 : index
    %78 = vector.load %arg4[%c0_94, %c0_95] : memref<128x8xf32, #tpu.memory_space<vmem>>, vector<128x8xf32>
    %cst_96 = arith.constant dense<0.000000e+00> : vector<1x8xf32>
    %79 = tpu.matmul %73, %78, %cst_96 {dimension_numbers = #tpu.dot_dimension_numbers<[1], [0], [0], [1], [0, 0, 1, 1], [], []>} : vector<1x128xf32>, vector<128x8xf32>, vector<1x8xf32> -> vector<1x8xf32>
    %cst_97 = arith.constant 0.001953125 : f32
    %80 = vector.broadcast %cst_97 : f32 to vector<1x8xf32>
    %81 = arith.mulf %79, %80 : vector<1x8xf32>
    %82 = arith.mulf %77, %77 : vector<1x8xf32>
    %83 = arith.subf %81, %82 : vector<1x8xf32>
    %cst_98 = arith.constant 9.99999974E-6 : f32
    %84 = vector.broadcast %cst_98 : f32 to vector<1x8xf32>
    %85 = arith.addf %83, %84 : vector<1x8xf32>
    %86 = math.rsqrt %85 : vector<1x8xf32>
    %87 = arith.mulf %55, %86 : vector<1x8xf32>
    %88 = arith.mulf %77, %87 : vector<1x8xf32>
    %89 = arith.subf %56, %88 : vector<1x8xf32>
    %c0_99 = arith.constant 0 : index
    %c0_100 = arith.constant 0 : index
    %90 = vector.load %arg5[%c0_99, %c0_100] : memref<8x128xf32, #tpu.memory_space<vmem>>, vector<8x128xf32>
    %cst_101 = arith.constant dense<0.000000e+00> : vector<1x128xf32>
    %91 = tpu.matmul %87, %90, %cst_101 {dimension_numbers = #tpu.dot_dimension_numbers<[1], [0], [0], [1], [0, 0, 1, 1], [], []>} : vector<1x8xf32>, vector<8x128xf32>, vector<1x128xf32> -> vector<1x128xf32>
    %c0_102 = arith.constant 0 : index
    %c0_103 = arith.constant 0 : index
    %92 = vector.load %arg5[%c0_102, %c0_103] : memref<8x128xf32, #tpu.memory_space<vmem>>, vector<8x128xf32>
    %cst_104 = arith.constant dense<0.000000e+00> : vector<1x128xf32>
    %93 = tpu.matmul %89, %92, %cst_104 {dimension_numbers = #tpu.dot_dimension_numbers<[1], [0], [0], [1], [0, 0, 1, 1], [], []>} : vector<1x8xf32>, vector<8x128xf32>, vector<1x128xf32> -> vector<1x128xf32>
    %94 = vector.broadcast %91 : vector<1x128xf32> to vector<32x128xf32>
    %95 = arith.mulf %68, %94 : vector<32x128xf32>
    %96 = vector.broadcast %93 : vector<1x128xf32> to vector<32x128xf32>
    %97 = arith.addf %95, %96 : vector<32x128xf32>
    %cst_105 = arith.constant 0.000000e+00 : f32
    %98 = vector.broadcast %cst_105 : f32 to vector<32x128xf32>
    %99 = arith.maximumf %97, %98 : vector<32x128xf32>
    %c0_106 = arith.constant 0 : index
    %c0_107 = arith.constant 0 : index
    %100 = vector.load %arg6[%c0_106, %c0_107] : memref<32x128xf32, #tpu.memory_space<vmem>>, vector<32x128xf32>
    tpu.vector_store %arg6[%c0_106, %c0_107], %99 {strides = array<i32>} : memref<32x128xf32, #tpu.memory_space<vmem>>, vector<32x128xf32>,
    return
  }
}

</mosaic_0001>

<bundles_post_ra>
// kernel: tpu_custom_call.1
= control target key start
LH: loop header
LB: loop body
LE: loop exit
PB: predicated region body
PF: predicated region fallthrough
CT: control target
= control target key end

     0   :  { %11 = vsyncpa [#allocation5], 0  ;;  %s3358_s0 = inlined_call_operand.vmem [shape: f32[2,16,128], index: 0, kind: input, shape index: {}]   ;;  %s3359_s1 = inlined_call_operand.hbm [shape: bf16[896,128], index: 1, kind: input, shape index: {}]   ;;  %s3360_s2 = inlined_call_operand.hbm [shape: bf16[896,128], index: 2, kind: input, shape index: {}]   ;;  %s3361_s3 = inlined_call_operand.vmem [shape: f32[4,8], index: 3, kind: input, shape index: {}]   ;;  %s3362_s4 = inlined_call_operand.vmem [shape: f32[128,8], index: 4, kind: input, shape index: {}]   ;;  %s3363_s5 = inlined_call_operand.vmem [shape: f32[8,128], index: 5, kind: input, shape index: {}]   ;;  %s3364_s6 = inlined_call_operand.hbm [shape: f32[32,128], index: 6, kind: output, shape index: {}]  }
   0x1   :  { %12 = vsyncpa [#allocation8], 0 }
   0x2   :  { %13 = vsyncpa [#allocation6], 0  ;;  %s3054_s21 = smov [#allocation4]   ;;  %s2982_s25 = scalar_lea.hbm %s3359_s1, 7168 }
   0x3   :  { %s21_s22 = sshll.u32 %s3054_s21, 4  ;;  %p2983_p0 = scmp.ne.s32.totalorder %s3359_s1, %s2982_s25  ;;  %s22_s22 = int_to_ptr.vmem [resolvable:$true] %s21_s22 }
   0x4   :  { %p2986_p1 = scmp.lt.u32.totalorder %s2982_s25, %s3359_s1 }
   0x6   :  { %p2988_p2 = pnand %p2986_p1, %p2983_p0 }
   0x8   :  { %2991 = shalt.err (!%p2988_p2)
}
   0x9   :  { %s2992_s30 = scalar_lea.vmem %s22_s22, 7168  ;;  %p2997_p4 = scmp.lt.s32.totalorder %s22_s22, %s22_s22 }
   0xa   :  { %p2993_p3 = scmp.ne.s32.totalorder %s22_s22, %s2992_s30  ;;  %p2998_p5 = scmp.lt.s32.totalorder %s2992_s30, %s2992_s30 }
   0xc   :  { %p2999_p6 = por %p2998_p5, %p2997_p4 }
   0xe   :  { %p3000_p7 = pnand %p2999_p6, %p2993_p3 }
  0x10   :  { %3003 = shalt.err (!%p3000_p7)
}
  0x11   :  { %s3055_s7 = smov 64   ;;  %s3056_s8 = smov 4  }
  0x12   :  { %27 = dma.hbm_to_vmem [thread:$0]  %s3359_s1, 7168, %s22_s22, [#allocation5], %s3055_s7, %s3055_s7, %s3056_s8  }
  0x13   :  { %s3057_s11 = smov [#allocation7]   ;;  %s3004_s15 = scalar_lea.hbm %s3360_s2, 7168 }
  0x14   :  { %s33_s12 = sshll.u32 %s3057_s11, 4  ;;  %p3005_p8 = scmp.ne.s32.totalorder %s3360_s2, %s3004_s15  ;;  %s34_s12 = int_to_ptr.vmem [resolvable:$true] %s33_s12 }
  0x15   :  { %p3008_p9 = scmp.lt.u32.totalorder %s3004_s15, %s3360_s2 }
  0x17   :  { %p3010_p10 = pnand %p3008_p9, %p3005_p8 }
  0x19   :  { %3013 = shalt.err (!%p3010_p10)
}
  0x1a   :  { %s3014_s20 = scalar_lea.vmem %s34_s12, 7168  ;;  %p3019_p12 = scmp.lt.s32.totalorder %s34_s12, %s34_s12 }
  0x1b   :  { %p3015_p11 = scmp.ne.s32.totalorder %s34_s12, %s3014_s20  ;;  %p3020_p13 = scmp.lt.s32.totalorder %s3014_s20, %s3014_s20 }
  0x1d   :  { %p3021_p0 = por %p3020_p13, %p3019_p12 }
  0x1f   :  { %p3022_p1 = pnand %p3021_p0, %p3015_p11 }
  0x21   :  { %3025 = shalt.err (!%p3022_p1)
}
  0x22   :  { %39 = dma.hbm_to_vmem [thread:$0]  %s3360_s2, 7168, %s34_s12, [#allocation8], %s3055_s7, %s3055_s7, %s3056_s8  }
  0x23   :  { %3048 = dma.done.wait [#allocation5], 7168  }
  0x24   :  { %3049 = vsyncadd [#allocation5], 4294960128 }
  0x25   :  { %3050 = dma.done.wait [#allocation8], 7168  }
  0x26   :  { %3051 = vsyncadd [#allocation8], 4294960128  ;;  %v3058_v0 = vmov 0.0   ;;  %v2866_v1 = vld [vmem:[#allocation4 + $0x40] sm:$0xff]   ;;  %v2870_v5 = vld [vmem:[#allocation4 + $0x48] sm:$0xff]   ;;  %vm3060_vm0 = vmmov 0  }
  0x27   :  { %53 = vst [vmem:[#allocation2] sm:$0x7] %v3058_v0  ;;  %54 = vst [vmem:[#allocation2 + $0x18] sm:$0x7] %v3058_v0  ;;  %v2867_v2 = vld [vmem:[#allocation4 + $0xc0] sm:$0xff]   ;;  %2296 = vmatprep.subr.bf16.mxu0 %v2866_v1  ;;  %v2871_v6 = vld [vmem:[#allocation4 + $0xc8] sm:$0xff]  }
  0x28   :  { %55 = vst [vmem:[#allocation2 + $0x13] sm:$0x7] %v3058_v0  ;;  %56 = vst [vmem:[#allocation2 + $0x2b] sm:$0x7] %v3058_v0  ;;  %v2868_v3 = vld [vmem:[#allocation4] sm:$0xff]   ;;  %2324 = vmatprep.subr.bf16.mxu1 %v2867_v2  ;;  %v2872_v7 = vld [vmem:[#allocation4 + $0x8] sm:$0xff]  }
  0x29   :  { %65 = vst [vmem:[#allocation3] sm:$0x7] %v3058_v0  ;;  %66 = vst [vmem:[#allocation3 + $0x18] sm:$0x7] %v3058_v0  ;;  %v2869_v4 = vld [vmem:[#allocation4 + $0x80] sm:$0xff]   ;;  %2297 = vmatpush3.bf16.msra.mxu0 %v2868_v3  ;;  %v2873_v8 = vld [vmem:[#allocation4 + $0x88] sm:$0xff]  }
  0x2a   :  { %67 = vst [vmem:[#allocation3 + $0x13] sm:$0x7] %v3058_v0  ;;  %68 = vst [vmem:[#allocation3 + $0x2b] sm:$0x7] %v3058_v0  ;;  %2325 = vmatpush3.bf16.msra.mxu1 %v2869_v4  ;;  %2298 = vmatprep.subr.bf16.mxu0 %v2870_v5  ;;  %v2874_v9 = vld [vmem:[#allocation4 + $0x50] sm:$0xff]   ;;  %v2878_v13 = vld [vmem:[#allocation4 + $0x58] sm:$0xff]  }
  0x2b   :  { %2326 = vmatprep.subr.bf16.mxu1 %v2871_v6  ;;  %v2875_v10 = vld [vmem:[#allocation4 + $0xd0] sm:$0xff]   ;;  %v2879_v14 = vld [vmem:[#allocation4 + $0xd8] sm:$0xff]   ;;  %v2882_v17 = vld [vmem:[#allocation4 + $0x60] sm:$0xff]   ;;  %vm945_vm1 = vcmask 64512   ;;  %s3061_s17 = smov [#allocation9]  }
  0x2c   :  { %v2876_v11 = vld [vmem:[#allocation4 + $0x10] sm:$0xff]   ;;  %v2880_v15 = vld [vmem:[#allocation4 + $0x18] sm:$0xff]   ;;  %v2883_v18 = vld [vmem:[#allocation4 + $0xe0] sm:$0xff]  }
  0x2d   :  { %2299 = vmatpush3.bf16.msra.mxu0 %v2872_v7  ;;  %v2877_v12 = vld [vmem:[#allocation4 + $0x90] sm:$0xff]   ;;  %v2881_v16 = vld [vmem:[#allocation4 + $0x98] sm:$0xff]   ;;  %v2884_v19 = vld [vmem:[#allocation4 + $0x20] sm:$0xff]  }
  0x2e   :  { %2327 = vmatpush3.bf16.msra.mxu1 %v2873_v8  ;;  %2300 = vmatprep.subr.bf16.mxu0 %v2874_v9  ;;  %v2885_v20 = vld [vmem:[#allocation4 + $0xa0] sm:$0xff]   ;;  %v2886_v21 = vld [vmem:[#allocation4 + $0x68] sm:$0xff]   ;;  %v2890_v25 = vld [vmem:[#allocation4 + $0x70] sm:$0xff]  }
  0x2f   :  { %2328 = vmatprep.subr.bf16.mxu1 %v2875_v10  ;;  %v2887_v22 = vld [vmem:[#allocation4 + $0xe8] sm:$0xff]   ;;  %v2891_v26 = vld [vmem:[#allocation4 + $0xf0] sm:$0xff]   ;;  %v2894_v29 = vld [vmem:[#allocation4 + $0x78] sm:$0xff]  }
  0x30   :  { %v2888_v23 = vld [vmem:[#allocation4 + $0x28] sm:$0xff]   ;;  %v2892_v27 = vld [vmem:[#allocation4 + $0x30] sm:$0xff]   ;;  %v2895_v30 = vld [vmem:[#allocation4 + $0xf8] sm:$0xff]  }
  0x31   :  { %2301 = vmatpush3.bf16.msra.mxu0 %v2876_v11  ;;  %v2889_v24 = vld [vmem:[#allocation4 + $0xa8] sm:$0xff]   ;;  %v2893_v28 = vld [vmem:[#allocation4 + $0xb0] sm:$0xff]   ;;  %v2896_v31 = vld [vmem:[#allocation4 + $0x38] sm:$0xff]  }
  0x32   :  { %2329 = vmatpush3.bf16.msra.mxu1 %v2877_v12  ;;  %2302 = vmatprep.subr.bf16.mxu0 %v2878_v13  ;;  %v2897_v32 = vld [vmem:[#allocation4 + $0xb8] sm:$0xff]   ;;  %v57_v33 = vld [vmem:[%s3358_s0] sm:$0xff]  ;;  %v58_v34 = vld [vmem:[%s3358_s0 + $0x8] sm:$0xff] }
  0x33   :  { %2330 = vmatprep.subr.bf16.mxu1 %v2879_v14  ;;  %61 = vst [vmem:[#allocation2 + $0x3] sm:$0xff] %v57_v33  ;;  %62 = vst [vmem:[#allocation2 + $0xb] sm:$0xff] %v58_v34  ;;  %v102_v35 = vpack.c.bf16 %v58_v34, %v57_v33  ;;  %v2898_v36 = vld [vmem:[#allocation4 + $0x140] sm:$0xff]   ;;  %v2900_v42 = vld [vmem:[#allocation4 + $0x148] sm:$0xff]  }
  0x34   :  { %v2901_v37 = vld [vmem:[#allocation4 + $0x180] sm:$0xff]   ;;  %v2904_v49 = vld [vmem:[#allocation4 + $0x188] sm:$0xff]   ;;  %v2903_v51 = vld [vmem:[#allocation4 + $0x150] sm:$0xff]  }
  0x35   :  { %2303 = vmatpush3.bf16.msra.mxu0 %v2880_v15  ;;  %642 = vmatprep.mubr.bf16.mxu1 %v102_v35  ;;  %v2899_v38 = vld [vmem:[#allocation4 + $0x100] sm:$0xff]   ;;  %v2902_v50 = vld [vmem:[#allocation4 + $0x108] sm:$0xff]   ;;  %v2907_v52 = vld [vmem:[#allocation4 + $0x190] sm:$0xff]  }
  0x36   :  { %2331 = vmatpush3.bf16.msra.mxu1 %v2881_v16  ;;  %2304 = vmatprep.subr.bf16.mxu0 %v2882_v17  ;;  %v2905_v53 = vld [vmem:[#allocation4 + $0x110] sm:$0xff]   ;;  %v2906_v54 = vld [vmem:[#allocation4 + $0x158] sm:$0xff]   ;;  %v2909_v60 = vld [vmem:[#allocation4 + $0x160] sm:$0xff]  }
  0x37   :  { %2332 = vmatprep.subr.bf16.mxu1 %v2883_v18  ;;  %v59_v55 = vld [vmem:[%s3358_s0 + $0x10] sm:$0xff]  ;;  %v60_v56 = vld [vmem:[%s3358_s0 + $0x18] sm:$0xff]  ;;  %v2913_v61 = vld [vmem:[#allocation4 + $0x1a0] sm:$0xff]  }
  0x38   :  { %63 = vst [vmem:[#allocation2 + $0x1b] sm:$0xff] %v59_v55  ;;  %v2910_v57 = vld [vmem:[#allocation4 + $0x198] sm:$0xff]   ;;  %64 = vst [vmem:[#allocation2 + $0x23] sm:$0xff] %v60_v56  ;;  %v109_v58 = vpack.c.bf16 %v60_v56, %v59_v55  ;;  %v2911_v62 = vld [vmem:[#allocation4 + $0x120] sm:$0xff]  }
  0x39   :  { %2305 = vmatpush3.bf16.msra.mxu0 %v2884_v19  ;;  %v2908_v59 = vld [vmem:[#allocation4 + $0x118] sm:$0xff]   ;;  %v2912_v7 = vld [vmem:[#allocation4 + $0x168] sm:$0xff]   ;;  %v2915_v14 = vld [vmem:[#allocation4 + $0x170] sm:$0xff]  }
  0x3a   :  { %2333 = vmatpush3.bf16.msra.mxu1 %v2885_v20  ;;  %2306 = vmatprep.subr.bf16.mxu0 %v2886_v21  ;;  %v75_v39 = vld [vmem:[#allocation2 + $0x1] sm:$0xff]  ;;  %v76_v40 = vld [vmem:[#allocation2 + $0x9] sm:$0xff]  ;;  %v2918_v20 = vld [vmem:[#allocation4 + $0x178] sm:$0xff]  }
  0x3b   :  { %2334 = vmatprep.subr.bf16.mxu1 %v2887_v22  ;;  %v71_v41 = vld [vmem:[#allocation2] sm:$0xff]  ;;  %v100_v43 = vpack.c.bf16 %v76_v40, %v75_v39  ;;  %v72_v44 = vld [vmem:[#allocation2 + $0x8] sm:$0xff]  ;;  %v2919_v16 = vld [vmem:[#allocation4 + $0x1b0] sm:$0xff]   ;;  %v3059_v39 = vmov 0.0|0.0  }
  0x3c   :  { %v79_v45 = vld [vmem:[#allocation2 + $0x2] sm:$0xff]  ;;  %v80_v46 = vld [vmem:[#allocation2 + $0xa] sm:$0xff]  ;;  %v99_v47 = vpack.c.bf16 %v72_v44, %v71_v41  ;;  %v2921_v22 = vld [vmem:[#allocation4 + $0x1b8] sm:$0xff]  }
  0x3d   :  { %2307 = vmatpush3.bf16.msra.mxu0 %v2888_v23  ;;  %v101_v48 = vpack.c.bf16 %v80_v46, %v79_v45  ;;  %593 = vmatprep.mubr.bf16.mxu0 %v100_v43  ;;  %v2916_v10 = vld [vmem:[#allocation4 + $0x1a8] sm:$0xff]   ;;  %v2917_v19 = vld [vmem:[#allocation4 + $0x130] sm:$0xff]   ;;  %v2920_v23 = vld [vmem:[#allocation4 + $0x138] sm:$0xff]  }
  0x3e   :  { %2335 = vmatpush3.bf16.msra.mxu1 %v2889_v24  ;;  %2308 = vmatprep.subr.bf16.mxu0 %v2890_v25  ;;  %v91_v11 = vld [vmem:[#allocation2 + $0x5] sm:$0xff]  ;;  %v92_v12 = vld [vmem:[#allocation2 + $0xd] sm:$0xff]  ;;  %v782_v41 = vld [vmem:[%s3362_s4 + $0x18] sm:$0xff] }
  0x3f   :  { %2336 = vmatprep.subr.bf16.mxu1 %v2891_v26  ;;  %v77_v63 = vld [vmem:[#allocation2 + $0x19] sm:$0xff]  ;;  %v78_v3 = vld [vmem:[#allocation2 + $0x21] sm:$0xff]  ;;  %v104_v15 = vpack.c.bf16 %v92_v12, %v91_v11  ;;  %v96_v18 = vld [vmem:[#allocation2 + $0xe] sm:$0xff] }
  0x40   :  { %v73_v1 = vld [vmem:[#allocation2 + $0x18] sm:$0xff]  ;;  %v74_v4 = vld [vmem:[#allocation2 + $0x20] sm:$0xff]  ;;  %v107_v6 = vpack.c.bf16 %v78_v3, %v77_v63  ;;  %v2914_v13 = vld [vmem:[#allocation4 + $0x128] sm:$0xff]  }
  0x41   :  { %2309 = vmatpush3.bf16.msra.mxu0 %v2892_v27  ;;  %v81_v2 = vld [vmem:[#allocation2 + $0x1a] sm:$0xff]  ;;  %v82_v5 = vld [vmem:[#allocation2 + $0x22] sm:$0xff]  ;;  %v106_v8 = vpack.c.bf16 %v74_v4, %v73_v1  ;;  %v88_v25 = vld [vmem:[#allocation2 + $0xc] sm:$0xff] }
  0x42   :  { %2337 = vmatpush3.bf16.msra.mxu1 %v2893_v28  ;;  %2310 = vmatprep.subr.bf16.mxu0 %v2894_v29  ;;  %v108_v9 = vpack.c.bf16 %v82_v5, %v81_v2  ;;  %v95_v17 = vld [vmem:[#allocation2 + $0x6] sm:$0xff]  ;;  %v97_v26 = vld [vmem:[#allocation2 + $0x1e] sm:$0xff]  ;;  %v781_v40 = vld [vmem:[%s3362_s4 + $0x10] sm:$0xff] }
  0x43   :  { %2338 = vmatprep.subr.bf16.mxu1 %v2895_v30  ;;  %v105_v21 = vpack.c.bf16 %v96_v18, %v95_v17  ;;  %v87_v24 = vld [vmem:[#allocation2 + $0x4] sm:$0xff]  ;;  %v89_v33 = vld [vmem:[#allocation2 + $0x1c] sm:$0xff]  ;;  %v785_v46 = vld [vmem:[%s3362_s4 + $0x30] sm:$0xff] }
  0x44   :  { %v98_v27 = vld [vmem:[#allocation2 + $0x26] sm:$0xff]  ;;  %v93_v28 = vld [vmem:[#allocation2 + $0x1d] sm:$0xff]  ;;  %v103_v30 = vpack.c.bf16 %v88_v25, %v87_v24 }
  0x45   :  { %2311 = vmatpush3.bf16.msra.mxu0 %v2896_v31  ;;  %v94_v29 = vld [vmem:[#allocation2 + $0x25] sm:$0xff]  ;;  %v112_v31 = vpack.c.bf16 %v98_v27, %v97_v26 }
  0x46   :  { %2339 = vmatpush3.bf16.msra.mxu1 %v2897_v32  ;;  %2352 = vmatprep.subr.bf16.mxu0 %v2898_v36  ;;  %v111_v32 = vpack.c.bf16 %v94_v29, %v93_v28  ;;  %v90_v34 = vld [vmem:[#allocation2 + $0x24] sm:$0xff] }
  0x47   :  { %2560 = vmatprep.subr.bf16.mxu1 %v2901_v37  ;;  %v110_v35 = vpack.c.bf16 %v90_v34, %v89_v33  ;;  %v779_v36 = vld [vmem:[%s3362_s4] sm:$0xff]  ;;  %v784_v44 = vld [vmem:[%s3362_s4 + $0x28] sm:$0xff] }
  0x48   :  { %594 = vmatmul.mubr.bf16.vlgmr.msra.gmra.mrb[0].mxu0 %v99_v47  ;;  %v783_v43 = vld [vmem:[%s3362_s4 + $0x20] sm:$0xff]  ;;  %v786_v47 = vld [vmem:[%s3362_s4 + $0x38] sm:$0xff]  ;;  %v792_v56 = vld [vmem:[%s3362_s4 + $0x68] sm:$0xff] }
  0x49   :  { %643 = vmatmul.mubr.bf16.vlgmr.msra.gmra.mrb[0].mxu1 %v101_v48  ;;  %2353 = vmatpush3.bf16.msra.mxu0 %v2899_v38  ;;  %v3175_v45 = vpack.c.bf16 %v784_v44, %v783_v43  ;;  %v3187_v48 = vpack.c.bf16 %v786_v47, %v785_v46  ;;  %v791_v55 = vld [vmem:[%s3362_s4 + $0x60] sm:$0xff] }
  0x4a   :  { %2561 = vmatpush3.bf16.msra.mxu1 %v2901_v37  ;;  %2354 = vmatprep.subr.bf16.mxu0 %v2900_v42  ;;  %v780_v37 = vld [vmem:[%s3362_s4 + $0x8] sm:$0xff]  ;;  %v3163_v42 = vpack.c.bf16 %v782_v41, %v781_v40 }
  0x4b   :  { %2562 = vmatprep.subr.bf16.mxu1 %v2904_v49  ;;  %650 = vmatprep.mubr.bf16.mxu1 %v109_v58  ;;  %v3149_v38 = vpack.c.bf16 %v780_v37, %v779_v36  ;;  %v793_v58 = vld [vmem:[%s3362_s4 + $0x70] sm:$0xff] }
  0x4c   :  { %601 = vmatprep.mubr.bf16.mxu0 %v107_v6 }
  0x4d   :  { %2355 = vmatpush3.bf16.msra.mxu0 %v2902_v50  ;;  %v788_v50 = vld [vmem:[%s3362_s4 + $0x48] sm:$0xff] }
  0x4e   :  { %2563 = vmatpush3.bf16.msra.mxu1 %v2904_v49  ;;  %2356 = vmatprep.subr.bf16.mxu0 %v2903_v51  ;;  %v787_v49 = vld [vmem:[%s3362_s4 + $0x40] sm:$0xff] }
  0x4f   :  { %2564 = vmatprep.subr.bf16.mxu1 %v2907_v52  ;;  %v3199_v51 = vpack.c.bf16 %v788_v50, %v787_v49 }
  0x50   :  { %602 = vmatmul.mubr.bf16.gmra.mrb[4].mxu0 %v106_v8 }
  0x51   :  { %2357 = vmatpush3.bf16.msra.mxu0 %v2905_v53  ;;  %651 = vmatmul.mubr.bf16.gmra.mrb[4].mxu1 %v108_v9  ;;  %v790_v53 = vld [vmem:[%s3362_s4 + $0x58] sm:$0xff] }
  0x52   :  { %2565 = vmatpush3.bf16.msra.mxu1 %v2907_v52  ;;  %2358 = vmatprep.subr.bf16.mxu0 %v2906_v54  ;;  %v789_v52 = vld [vmem:[%s3362_s4 + $0x50] sm:$0xff] }
  0x53   :  { %2566 = vmatprep.subr.bf16.mxu1 %v2910_v57  ;;  %691 = vmatprep.mubr.bf16.mxu0 %v104_v15  ;;  %v3211_v54 = vpack.c.bf16 %v790_v53, %v789_v52 }
  0x54   :  { %2576 = vmatprep.mubr.bf16.mxu1 %v105_v21 }
  0x55   :  { %2359 = vmatpush3.bf16.msra.mxu0 %v2908_v59  ;;  %v794_v59 = vld [vmem:[%s3362_s4 + $0x78] sm:$0xff] }
  0x56   :  { %2567 = vmatpush3.bf16.msra.mxu1 %v2910_v57  ;;  %2360 = vmatprep.subr.bf16.mxu0 %v2909_v60  ;;  %v3223_v57 = vpack.c.bf16 %v792_v56, %v791_v55  ;;  %v3235_v60 = vpack.c.bf16 %v794_v59, %v793_v58 }
  0x57   :  { %2568 = vmatprep.subr.bf16.mxu1 %v2913_v61 }
  0x59   :  { %2361 = vmatpush3.bf16.msra.mxu0 %v2911_v62 }
  0x5a   :  { %2569 = vmatpush3.bf16.msra.mxu1 %v2913_v61  ;;  %2362 = vmatprep.subr.bf16.mxu0 %v2912_v7 }
  0x5b   :  { %2570 = vmatprep.subr.bf16.mxu1 %v2916_v10 }
  0x5d   :  { %2363 = vmatpush3.bf16.msra.mxu0 %v2914_v13 }
  0x5e   :  { %2571 = vmatpush3.bf16.msra.mxu1 %v2916_v10  ;;  %2364 = vmatprep.subr.bf16.mxu0 %v2915_v14 }
  0x5f   :  { %2572 = vmatprep.subr.bf16.mxu1 %v2919_v16 }
  0x61   :  { %2365 = vmatpush3.bf16.msra.mxu0 %v2917_v19 }
  0x62   :  { %2573 = vmatpush3.bf16.msra.mxu1 %v2919_v16  ;;  %2366 = vmatprep.subr.bf16.mxu0 %v2918_v20 }
  0x63   :  { %2574 = vmatprep.subr.bf16.mxu1 %v2921_v22 }
  0x65   :  { %2367 = vmatpush3.bf16.msra.mxu0 %v2920_v23 }
  0x66   :  { %2575 = vmatpush3.bf16.msra.mxu1 %v2921_v22  ;;  %2760 = vmatprep.subr.bf16.mxu0 %v3059_v39 }
  0x67   :  { %2784 = vmatprep.subr.bf16.mxu1 %v3059_v39 }
  0x68   :  { %692 = vmatmul.mubr.bf16.vlgmr.msra.gmra.mrb[8].mxu0 %v103_v30 }
  0x69   :  { %2577 = vmatmul.mubr.bf16.vlgmr.msra.gmra.mrb[8].mxu1 %v112_v31  ;;  %699 = vmatprep.mubr.bf16.mxu0 %v111_v32 }
  0x6a   :  { %2762 = vmatpush3.bf16.msra.mxu0 %v3149_v38  ;;  %2786 = vmatpush3.bf16.msra.mxu1 %v3149_v38 }
  0x6b   :  { %2763 = vmatprep.subr.bf16.mxu0 %v3059_v39  ;;  %2787 = vmatprep.subr.bf16.mxu1 %v3059_v39 }
  0x6c   :  { %2647 = vmatprep.mubr.msk.f32.mxu1 %vm3060_vm0, %v3058_v0 }
  0x6e   :  { %2765 = vmatpush3.bf16.msra.mxu0 %v3163_v42  ;;  %2789 = vmatpush3.bf16.msra.mxu1 %v3163_v42 }
  0x6f   :  { %2766 = vmatprep.subr.bf16.mxu0 %v3059_v39  ;;  %2790 = vmatprep.subr.bf16.mxu1 %v3059_v39 }
  0x70   :  { %700 = vmatmul.mubr.bf16.gmra.mrb[12].mxu0 %v110_v35 }
  0x71   :  { %2612 = vmatprep.mubr.msk.f32.mxu0 %vm3060_vm0, %v3058_v0 }
  0x72   :  { %2768 = vmatpush3.bf16.msra.mxu0 %v3175_v45  ;;  %2792 = vmatpush3.bf16.msra.mxu1 %v3175_v45 }
  0x73   :  { %2769 = vmatprep.subr.bf16.mxu0 %v3059_v39  ;;  %2793 = vmatprep.subr.bf16.mxu1 %v3059_v39 }
  0x76   :  { %2771 = vmatpush3.bf16.msra.mxu0 %v3187_v48  ;;  %2795 = vmatpush3.bf16.msra.mxu1 %v3187_v48 }
  0x77   :  { %2772 = vmatprep.subr.bf16.mxu0 %v3059_v39  ;;  %2796 = vmatprep.subr.bf16.mxu1 %v3059_v39 }
  0x7a   :  { %2774 = vmatpush3.bf16.msra.mxu0 %v3199_v51  ;;  %2798 = vmatpush3.bf16.msra.mxu1 %v3199_v51 }
  0x7b   :  { %2775 = vmatprep.subr.bf16.mxu0 %v3059_v39  ;;  %2799 = vmatprep.subr.bf16.mxu1 %v3059_v39 }
  0x7e   :  { %2777 = vmatpush3.bf16.msra.mxu0 %v3211_v54  ;;  %2801 = vmatpush3.bf16.msra.mxu1 %v3211_v54 }
  0x7f   :  { %2778 = vmatprep.subr.bf16.mxu0 %v3059_v39  ;;  %2802 = vmatprep.subr.bf16.mxu1 %v3059_v39 }
  0x82   :  { %2780 = vmatpush3.bf16.msra.mxu0 %v3223_v57  ;;  %2804 = vmatpush3.bf16.msra.mxu1 %v3223_v57 }
  0x83   :  { %2781 = vmatprep.subr.bf16.mxu0 %v3059_v39  ;;  %2805 = vmatprep.subr.bf16.mxu1 %v3059_v39 }
  0x86   :  { %2783 = vmatpush3.bf16.msra.mxu0 %v3235_v60  ;;  %2807 = vmatpush3.bf16.msra.mxu1 %v3235_v60 }
  0x87   :  { %2650 = vmatprep.subr.mxu0 %v3058_v0  ;;  %2655 = vmatprep.subr.mxu1 %v3058_v0 }
 0x11b   :  { %v2312_v61 = vpop.f32.mrb[0].mxu0 }
 0x11c   :  { %v2340_v62 = vpop.f32.mrb[0].mxu1  ;;  %v2313_v63 = vpop.f32.mrb[1].mxu0 }
 0x11d   :  { %v2341_v1 = vpop.f32.mrb[1].mxu1  ;;  %v2314_v2 = vadd.f32 %v2313_v63, %v2312_v61  ;;  %v2315_v4 = vpop.f32.mrb[2].mxu0 }
 0x11e   :  { %v2342_v3 = vadd.f32 %v2341_v1, %v2340_v62  ;;  %v2343_v5 = vpop.f32.mrb[2].mxu1  ;;  %v2316_v6 = vpop.f32.mrb[3].mxu0 }
 0x11f   :  { %v2344_v7 = vpop.f32.mrb[3].mxu1  ;;  %v2317_v9 = vadd.f32 %v2316_v6, %v2315_v4 }
 0x120   :  { %v645_v8 = vadd.f32 %v2342_v3, %v2314_v2  ;;  %v2345_v10 = vadd.f32 %v2344_v7, %v2343_v5 }
 0x122   :  { %v648_v11 = vadd.f32 %v2345_v10, %v2317_v9 }
 0x123   :  { %v2318_v14 = vpop.f32.mrb[4].mxu0 }
 0x124   :  { %v2346_v12 = vpop.f32.mrb[4].mxu1  ;;  %v2319_v17 = vpop.f32.mrb[5].mxu0 }
 0x125   :  { %v2347_v13 = vpop.f32.mrb[5].mxu1  ;;  %v2320_v19 = vadd.f32 %v2319_v17, %v2318_v14  ;;  %v2321_v20 = vpop.f32.mrb[6].mxu0 }
 0x126   :  { %v2348_v15 = vadd.f32 %v2347_v13, %v2346_v12  ;;  %v2349_v16 = vpop.f32.mrb[6].mxu1  ;;  %v2322_v22 = vpop.f32.mrb[7].mxu0 }
 0x127   :  { %v2350_v18 = vpop.f32.mrb[7].mxu1  ;;  %v2323_v24 = vadd.f32 %v2322_v22, %v2321_v20  ;;  %v2923_v20 = vld [vmem:[#allocation7 + $0xc0] sm:$0xff]  }
 0x128   :  { %v2351_v21 = vadd.f32 %v2350_v18, %v2349_v16  ;;  %v653_v23 = vadd.f32 %v2348_v15, %v2320_v19  ;;  %v3272_v18 = vld [vmem:[%s3363_s5] sm:$0xff] }
 0x129   :  { %v2922_v19 = vld [vmem:[#allocation7 + $0x40] sm:$0xff]  }
 0x12a   :  { %v656_v25 = vadd.f32 %v2351_v21, %v2323_v24 }
 0x13b   :  { %v2368_v26 = vpop.f32.mrb[8].mxu0 }
 0x13c   :  { %v2578_v27 = vpop.f32.mrb[8].mxu1  ;;  %v2369_v28 = vpop.f32.mrb[9].mxu0 }
 0x13d   :  { %v742_v29 = vpop.f32.mrb[9].mxu1  ;;  %v2370_v30 = vadd.f32 %v2369_v28, %v2368_v26  ;;  %v2371_v31 = vpop.f32.mrb[10].mxu0 }
 0x13e   :  { %v2579_v32 = vpop.f32.mrb[10].mxu1  ;;  %v2372_v33 = vpop.f32.mrb[11].mxu0 }
 0x13f   :  { %v745_v34 = vpop.f32.mrb[11].mxu1  ;;  %v2373_v35 = vadd.f32 %v2372_v33, %v2371_v31  ;;  %v694_v36 = vadd.f32 %v2370_v30, %v645_v8  ;;  %v69_v30 = vld [vmem:[%s3361_s3] sm:$0x1] }
 0x141   :  { %v3245_v37 = vadd.f32 %v742_v29, %v694_v36  ;;  %v697_v40 = vadd.f32 %v2373_v35, %v648_v11  ;;  %v70_v35 = vld [vmem:[%s3361_s3 + $0x1] sm:$0x1] }
 0x143   :  { %v3247_v41 = vadd.f32 %v745_v34, %v697_v40  ;;  %v2374_v43 = vpop.f32.mrb[12].mxu0  ;;  %v766_v55 = vmul.f32 %v3245_v37, %v3245_v37  ;;  %v2926_v34 = vld [vmem:[#allocation7 + $0x48] sm:$0xff]   ;;  %v2925_v40 = vld [vmem:[#allocation7 + $0x80] sm:$0xff]  }
 0x144   :  { %v2375_v44 = vpop.f32.mrb[13].mxu0 }
 0x145   :  { %v2376_v46 = vadd.f32 %v2375_v44, %v2374_v43  ;;  %v2377_v47 = vpop.f32.mrb[14].mxu0  ;;  %v767_v50 = vmul.f32 %v3247_v41, %v3247_v41  ;;  %v757_v56 = vadd.f32 %v3247_v41, %v3245_v37  ;;  %v2928_v43 = vld [vmem:[#allocation7 + $0x8] sm:$0xff]  }
 0x146   :  { %v2378_v49 = vpop.f32.mrb[15].mxu0 }
 0x147   :  { %v702_v52 = vadd.f32 %v2376_v46, %v653_v23  ;;  %v2379_v53 = vadd.f32 %v2378_v49, %v2377_v47  ;;  %v770_v61 = vadd.f32 %v767_v50, %v766_v55  ;;  %v2927_v46 = vld [vmem:[#allocation7 + $0xc8] sm:$0xff]   ;;  %v2930_v47 = vld [vmem:[#allocation7 + $0x50] sm:$0xff]   ;;  %v2935_v55 = vld [vmem:[#allocation7 + $0xd8] sm:$0xff]  }
 0x148   :  { %v2929_v49 = vld [vmem:[#allocation7 + $0x88] sm:$0xff]   ;;  %v2932_v50 = vld [vmem:[#allocation7 + $0x10] sm:$0xff]  }
 0x149   :  { %v3255_v58 = vadd.f32 %v2578_v27, %v702_v52  ;;  %v705_v59 = vadd.f32 %v2379_v53, %v656_v25  ;;  %v2931_v52 = vld [vmem:[#allocation7 + $0xd0] sm:$0xff]  }
 0x14a   :  { %v2933_v53 = vld [vmem:[#allocation7 + $0x90] sm:$0xff]  }
 0x14b   :  { %v758_v62 = vadd.f32 %v757_v56, %v3255_v58  ;;  %v768_v63 = vmul.f32 %v3255_v58, %v3255_v58  ;;  %v3260_v1 = vadd.f32 %v2579_v32, %v705_v59  ;;  %v2924_v32 = vld [vmem:[#allocation7] sm:$0xff]   ;;  %v2934_v56 = vld [vmem:[#allocation7 + $0x58] sm:$0xff]  }
 0x14c   :  { %v2937_v59 = vld [vmem:[#allocation7 + $0x98] sm:$0xff]  }
 0x14d   :  { %v771_v2 = vadd.f32 %v770_v61, %v768_v63  ;;  %v759_v3 = vadd.f32 %v758_v62, %v3260_v1  ;;  %v769_v4 = vmul.f32 %v3260_v1, %v3260_v1  ;;  %v2936_v61 = vld [vmem:[#allocation7 + $0x18] sm:$0xff]   ;;  %v2939_v62 = vld [vmem:[#allocation7 + $0xe0] sm:$0xff]  }
 0x14e   :  { %v2938_v63 = vld [vmem:[#allocation7 + $0x60] sm:$0xff]  }
 0x14f   :  { %v760_v5 = vrot.slane %v759_v3, 4  ;;  %v772_v6 = vadd.f32 %v771_v2, %v769_v4  ;;  %v2941_v2 = vld [vmem:[#allocation7 + $0xa0] sm:$0xff]   ;;  %v2943_v4 = vld [vmem:[#allocation7 + $0xe8] sm:$0xff]  }
 0x151   :  { %v761_v7 = vadd.f32 %v760_v5, %v759_v3  ;;  %v773_v8 = vrot.slane %v772_v6, 4  ;;  %v2940_v3 = vld [vmem:[#allocation7 + $0x20] sm:$0xff]   ;;  %v2942_v5 = vld [vmem:[#allocation7 + $0x68] sm:$0xff]  }
 0x153   :  { %v762_v9 = vrot.slane %v761_v7, 2  ;;  %v774_v10 = vadd.f32 %v773_v8, %v772_v6  ;;  %v2945_v6 = vld [vmem:[#allocation7 + $0xa8] sm:$0xff]   ;;  %v2947_v8 = vld [vmem:[#allocation7 + $0xf0] sm:$0xff]  }
 0x155   :  { %v763_v11 = vadd.f32 %v762_v9, %v761_v7  ;;  %v775_v12 = vrot.slane %v774_v10, 2  ;;  %v2944_v7 = vld [vmem:[#allocation7 + $0x28] sm:$0xff]   ;;  %v2946_v9 = vld [vmem:[#allocation7 + $0x70] sm:$0xff]  }
 0x157   :  { %v764_v13 = vrot.slane %v763_v11, 1  ;;  %v776_v14 = vadd.f32 %v775_v12, %v774_v10  ;;  %v2948_v10 = vld [vmem:[#allocation7 + $0x30] sm:$0xff]   ;;  %v2950_v12 = vld [vmem:[#allocation7 + $0x78] sm:$0xff]  }
 0x159   :  { %v765_v15 = vadd.f32 %v764_v13, %v763_v11  ;;  %v777_v16 = vrot.slane %v776_v14, 1  ;;  %v2949_v11 = vld [vmem:[#allocation7 + $0xb0] sm:$0xff]   ;;  %v2951_v13 = vld [vmem:[#allocation7 + $0xf8] sm:$0xff]  }
 0x15b   :  { %2613 = vmatmul.mubr.f32.vlgmr.msra.gmra.mrb[16].mxu0 %v765_v15  ;;  %v778_v17 = vadd.f32 %v777_v16, %v776_v14  ;;  %v2953_v14 = vld [vmem:[#allocation7 + $0xb8] sm:$0xff]   ;;  %v2955_v16 = vld [vmem:[#allocation7 + $0x180] sm:$0xff]  }
 0x15c   :  { %2652 = vmatprep.mubr.msk.f32.mxu0 %vm3060_vm0, %v3058_v0  ;;  %2651 = vmatpush3.msra.mxu0 %v3272_v18  ;;  %v2952_v15 = vld [vmem:[#allocation7 + $0x38] sm:$0xff]  }
 0x15d   :  { %2648 = vmatmul.mubr.f32.vlgmr.msra.gmra.mrb[12].mxu1 %v778_v17  ;;  %2428 = vmatprep.subr.bf16.mxu0 %v2922_v19  ;;  %v2954_v17 = vld [vmem:[#allocation7 + $0x140] sm:$0xff]   ;;  %v1092_v19 = vlaneseq }
 0x15e   :  { %2657 = vmatprep.mubr.msk.f32.mxu1 %vm3060_vm0, %v3058_v0  ;;  %2656 = vmatpush3.msra.mxu1 %v3272_v18 }
 0x15f   :  { %2456 = vmatprep.subr.bf16.mxu1 %v2923_v20  ;;  %v1093_v20 = vshrl.u32 %v1092_v19, 7  ;;  %v2964_v19 = vld [vmem:[#allocation7 + $0x198] sm:$0xff]  }
 0x22e   :  { %v861_v21 = vpop.f32.mrb[16].mxu0 }
 0x22f   :  { %v865_v22 = vmul.f32 0.001953125, %v861_v21  ;;  %v2614_v23 = vpop.f32.mrb[17].mxu0  ;;  %v3284_v21 = vsub.s32 0, %v1093_v20 }
 0x230   :  { %v932_v24 = vpop.f32.mrb[12].mxu1 }
 0x231   :  { %v937_v25 = vmul.f32 %v865_v22, %v865_v22  ;;  %v936_v26 = vmul.f32 0.001953125, %v932_v24  ;;  %v2649_v27 = vpop.f32.mrb[13].mxu1 }
 0x233   :  { %v938_v28 = vsub.f32 %v936_v26, %v937_v25 }
 0x235   :  { %v939_v29 = vadd.f32 1e-05, %v938_v28 }
 0x237   :  { %2978 = vrsqrt.f32 %v939_v29 }
 0x241   :  { %v2979_v31 = vpop.eup %2978 }
 0x242   :  { %v941_v33 = vmul.f32 %v2979_v31, %v69_v30 }
 0x244   :  { %2653 = vmatmul.mubr.msk.f32.vlgmr.msra.gmra.mrb[18].mxu0 %vm945_vm1, %v941_v33  ;;  %v942_v36 = vmul.f32 %v941_v33, %v865_v22 }
 0x245   :  { %2429 = vmatpush3.bf16.msra.mxu0 %v2924_v32 }
 0x246   :  { %v943_v44 = vsub.f32 %v70_v35, %v942_v36  ;;  %2430 = vmatprep.subr.bf16.mxu0 %v2926_v34 }
 0x248   :  { %2658 = vmatmul.mubr.msk.f32.vlgmr.msra.gmra.mrb[14].mxu1 %vm945_vm1, %v943_v44 }
 0x249   :  { %2457 = vmatpush3.bf16.msra.mxu1 %v2925_v40  ;;  %2431 = vmatpush3.bf16.msra.mxu0 %v2928_v43 }
 0x24a   :  { %2458 = vmatprep.subr.bf16.mxu1 %v2927_v46  ;;  %2432 = vmatprep.subr.bf16.mxu0 %v2930_v47 }
 0x24d   :  { %2459 = vmatpush3.bf16.msra.mxu1 %v2929_v49  ;;  %2433 = vmatpush3.bf16.msra.mxu0 %v2932_v50 }
 0x24e   :  { %2460 = vmatprep.subr.bf16.mxu1 %v2931_v52  ;;  %2434 = vmatprep.subr.bf16.mxu0 %v2934_v56 }
 0x251   :  { %2461 = vmatpush3.bf16.msra.mxu1 %v2933_v53  ;;  %2435 = vmatpush3.bf16.msra.mxu0 %v2936_v61 }
 0x252   :  { %2462 = vmatprep.subr.bf16.mxu1 %v2935_v55  ;;  %2436 = vmatprep.subr.bf16.mxu0 %v2938_v63  ;;  %v2958_v63 = vld [vmem:[#allocation7 + $0x188] sm:$0xff]  }
 0x255   :  { %2463 = vmatpush3.bf16.msra.mxu1 %v2937_v59  ;;  %2437 = vmatpush3.bf16.msra.mxu0 %v2940_v3  ;;  %v2959_v3 = vld [vmem:[#allocation7 + $0x108] sm:$0xff]  }
 0x256   :  { %2464 = vmatprep.subr.bf16.mxu1 %v2939_v62  ;;  %2438 = vmatprep.subr.bf16.mxu0 %v2942_v5  ;;  %v2957_v62 = vld [vmem:[#allocation7 + $0x148] sm:$0xff]   ;;  %v2961_v5 = vld [vmem:[#allocation7 + $0x190] sm:$0xff]  }
 0x259   :  { %2465 = vmatpush3.bf16.msra.mxu1 %v2941_v2  ;;  %2439 = vmatpush3.bf16.msra.mxu0 %v2944_v7 }
 0x25a   :  { %2466 = vmatprep.subr.bf16.mxu1 %v2943_v4  ;;  %2440 = vmatprep.subr.bf16.mxu0 %v2946_v9  ;;  %v2960_v4 = vld [vmem:[#allocation7 + $0x150] sm:$0xff]  }
 0x25d   :  { %2467 = vmatpush3.bf16.msra.mxu1 %v2945_v6  ;;  %2441 = vmatpush3.bf16.msra.mxu0 %v2948_v10  ;;  %v2962_v10 = vld [vmem:[#allocation7 + $0x110] sm:$0xff]  }
 0x25e   :  { %2468 = vmatprep.subr.bf16.mxu1 %v2947_v8  ;;  %2442 = vmatprep.subr.bf16.mxu0 %v2950_v12 }
 0x261   :  { %2469 = vmatpush3.bf16.msra.mxu1 %v2949_v11  ;;  %2443 = vmatpush3.bf16.msra.mxu0 %v2952_v15 }
 0x262   :  { %2470 = vmatprep.subr.bf16.mxu1 %v2951_v13  ;;  %2484 = vmatprep.subr.bf16.mxu0 %v2954_v17  ;;  %v2963_v17 = vld [vmem:[#allocation7 + $0x158] sm:$0xff]  }
 0x265   :  { %2471 = vmatpush3.bf16.msra.mxu1 %v2953_v14 }
 0x266   :  { %2660 = vmatprep.subr.bf16.mxu1 %v2955_v16 }
 0x317   :  { %v1015_v22 = vpop.f32.mrb[18].mxu0 }
 0x318   :  { %v1095_v23 = vrot.slane %v1015_v22, %v3284_v21  ;;  %v2654_v24 = vpop.f32.mrb[19].mxu0 }
 0x319   :  { %v2966_v24 = vld [vmem:[#allocation7 + $0x160] sm:$0xff]  }
 0x31a   :  { %v1096_v25 = vmul.f32 %v1095_v23, %v3245_v37  ;;  %v1097_v27 = vmul.f32 %v1095_v23, %v3247_v41  ;;  %v1098_v28 = vmul.f32 %v1095_v23, %v3255_v58  ;;  %v1099_v29 = vmul.f32 %v1095_v23, %v3260_v1  ;;  %v2956_v58 = vld [vmem:[#allocation7 + $0x100] sm:$0xff]   ;;  %v2965_v23 = vld [vmem:[#allocation7 + $0x118] sm:$0xff]  }
 0x31b   :  { %v1088_v26 = vpop.f32.mrb[14].mxu1 }
 0x31c   :  { %v1103_v30 = vrot.slane %v1088_v26, %v3284_v21  ;;  %v2659_v31 = vpop.f32.mrb[15].mxu1  ;;  %v2968_v26 = vld [vmem:[#allocation7 + $0x120] sm:$0xff]  }
 0x31d   :  { %v2973_v31 = vld [vmem:[#allocation7 + $0x1b0] sm:$0xff]  }
 0x31e   :  { %v1104_v32 = vadd.f32 %v1103_v30, %v1096_v25  ;;  %v1105_v33 = vadd.f32 %v1103_v30, %v1097_v27  ;;  %v1106_v34 = vadd.f32 %v1103_v30, %v1098_v28  ;;  %v1107_v35 = vadd.f32 %v1103_v30, %v1099_v29  ;;  %v2967_v25 = vld [vmem:[#allocation7 + $0x1a0] sm:$0xff]   ;;  %v2969_v27 = vld [vmem:[#allocation7 + $0x168] sm:$0xff]   ;;  %v2972_v30 = vld [vmem:[#allocation7 + $0x170] sm:$0xff]  }
 0x31f   :  { %v2970_v28 = vld [vmem:[#allocation7 + $0x1a8] sm:$0xff]  }
 0x320   :  { %v1108_v36 = vmax.f32 %v1104_v32, 0.0  ;;  %v1109_v40 = vmax.f32 %v1105_v33, 0.0  ;;  %v1110_v43 = vmax.f32 %v1106_v34, 0.0  ;;  %v1111_v44 = vmax.f32 %v1107_v35, 0.0  ;;  %v2971_v29 = vld [vmem:[#allocation7 + $0x128] sm:$0xff]   ;;  %v2974_v32 = vld [vmem:[#allocation7 + $0x130] sm:$0xff]  }
 0x321   :  { %v2975_v33 = vld [vmem:[#allocation7 + $0x178] sm:$0xff]  }
 0x322   :  { %1112 = vst [vmem:[#allocation3 + $0x3] sm:$0xff] %v1108_v36  ;;  %1113 = vst [vmem:[#allocation3 + $0xb] sm:$0xff] %v1109_v40  ;;  %v1149_v37 = vpack.c.bf16 %v1109_v40, %v1108_v36  ;;  %v1156_v41 = vpack.c.bf16 %v1111_v44, %v1110_v43  ;;  %v2976_v34 = vld [vmem:[#allocation7 + $0x1b8] sm:$0xff]  }
 0x323   :  { %1114 = vst [vmem:[#allocation3 + $0x1b] sm:$0xff] %v1110_v43  ;;  %1115 = vst [vmem:[#allocation3 + $0x23] sm:$0xff] %v1111_v44  ;;  %v2977_v35 = vld [vmem:[#allocation7 + $0x138] sm:$0xff]  }
 0x324   :  { %1689 = vmatprep.mubr.bf16.mxu1 %v1149_v37 }
 0x329   :  { %v1122_v1 = vld [vmem:[#allocation3 + $0x1] sm:$0xff]  ;;  %v1123_v46 = vld [vmem:[#allocation3 + $0x9] sm:$0xff] }
 0x32a   :  { %v1118_v47 = vld [vmem:[#allocation3] sm:$0xff]  ;;  %v1147_v49 = vpack.c.bf16 %v1123_v46, %v1122_v1  ;;  %v1119_v50 = vld [vmem:[#allocation3 + $0x8] sm:$0xff]  ;;  %v1120_v6 = vld [vmem:[#allocation3 + $0x18] sm:$0xff] }
 0x32b   :  { %v1126_v52 = vld [vmem:[#allocation3 + $0x2] sm:$0xff]  ;;  %v1127_v53 = vld [vmem:[#allocation3 + $0xa] sm:$0xff]  ;;  %v1146_v55 = vpack.c.bf16 %v1119_v50, %v1118_v47  ;;  %v1124_v59 = vld [vmem:[#allocation3 + $0x19] sm:$0xff] }
 0x32c   :  { %v1148_v56 = vpack.c.bf16 %v1127_v53, %v1126_v52  ;;  %v1125_v61 = vld [vmem:[#allocation3 + $0x21] sm:$0xff]  ;;  %1640 = vmatprep.mubr.bf16.mxu0 %v1147_v49  ;;  %v1139_v12 = vld [vmem:[#allocation3 + $0xd] sm:$0xff] }
 0x32d   :  { %1641 = vmatmul.mubr.bf16.vlgmr.msra.gmra.mrb[20].mxu0 %v1146_v55  ;;  %v1154_v2 = vpack.c.bf16 %v1125_v61, %v1124_v59  ;;  %v1121_v7 = vld [vmem:[#allocation3 + $0x20] sm:$0xff]  ;;  %v1143_v14 = vld [vmem:[#allocation3 + $0xe] sm:$0xff] }
 0x32e   :  { %1690 = vmatmul.mubr.bf16.vlgmr.msra.gmra.mrb[16].mxu1 %v1148_v56  ;;  %2485 = vmatpush3.bf16.msra.mxu0 %v2956_v58  ;;  %v1128_v8 = vld [vmem:[#allocation3 + $0x1a] sm:$0xff]  ;;  %v1129_v9 = vld [vmem:[#allocation3 + $0x22] sm:$0xff]  ;;  %v1153_v15 = vpack.c.bf16 %v1121_v7, %v1120_v6  ;;  %v1135_v40 = vld [vmem:[#allocation3 + $0xc] sm:$0xff] }
 0x32f   :  { %2661 = vmatpush3.bf16.msra.mxu1 %v2955_v16  ;;  %1648 = vmatprep.mubr.bf16.mxu0 %v1154_v2  ;;  %v1138_v11 = vld [vmem:[#allocation3 + $0x5] sm:$0xff]  ;;  %v1155_v16 = vpack.c.bf16 %v1129_v9, %v1128_v8  ;;  %v1140_v37 = vld [vmem:[#allocation3 + $0x1d] sm:$0xff] }
 0x330   :  { %1697 = vmatprep.mubr.bf16.mxu1 %v1156_v41  ;;  %2486 = vmatprep.subr.bf16.mxu0 %v2957_v62  ;;  %v1142_v13 = vld [vmem:[#allocation3 + $0x6] sm:$0xff]  ;;  %v1151_v20 = vpack.c.bf16 %v1139_v12, %v1138_v11  ;;  %v1144_v43 = vld [vmem:[#allocation3 + $0x1e] sm:$0xff] }
 0x331   :  { %2662 = vmatprep.subr.bf16.mxu1 %v2958_v63  ;;  %v1152_v22 = vpack.c.bf16 %v1143_v14, %v1142_v13  ;;  %v1134_v36 = vld [vmem:[#allocation3 + $0x4] sm:$0xff]  ;;  %v1136_v47 = vld [vmem:[#allocation3 + $0x1c] sm:$0xff] }
 0x332   :  { %2487 = vmatpush3.bf16.msra.mxu0 %v2959_v3  ;;  %v1145_v44 = vld [vmem:[#allocation3 + $0x26] sm:$0xff]  ;;  %v1150_v58 = vpack.c.bf16 %v1135_v40, %v1134_v36 }
 0x333   :  { %2663 = vmatpush3.bf16.msra.mxu1 %v2958_v63  ;;  %2488 = vmatprep.subr.bf16.mxu0 %v2960_v4  ;;  %v1141_v41 = vld [vmem:[#allocation3 + $0x25] sm:$0xff]  ;;  %v1159_v1 = vpack.c.bf16 %v1145_v44, %v1144_v43 }
 0x334   :  { %2664 = vmatprep.subr.bf16.mxu1 %v2961_v5  ;;  %v1158_v46 = vpack.c.bf16 %v1141_v41, %v1140_v37  ;;  %v1137_v49 = vld [vmem:[#allocation3 + $0x24] sm:$0xff] }
 0x335   :  { %1649 = vmatmul.mubr.bf16.gmra.mrb[24].mxu0 %v1153_v15  ;;  %v1157_v50 = vpack.c.bf16 %v1137_v49, %v1136_v47 }
 0x336   :  { %1698 = vmatmul.mubr.bf16.gmra.mrb[20].mxu1 %v1155_v16  ;;  %2489 = vmatpush3.bf16.msra.mxu0 %v2962_v10 }
 0x337   :  { %2665 = vmatpush3.bf16.msra.mxu1 %v2961_v5  ;;  %1738 = vmatprep.mubr.bf16.mxu0 %v1151_v20 }
 0x338   :  { %2676 = vmatprep.mubr.bf16.mxu1 %v1152_v22  ;;  %2490 = vmatprep.subr.bf16.mxu0 %v2963_v17 }
 0x339   :  { %2666 = vmatprep.subr.bf16.mxu1 %v2964_v19 }
 0x33a   :  { %2491 = vmatpush3.bf16.msra.mxu0 %v2965_v23 }
 0x33b   :  { %2667 = vmatpush3.bf16.msra.mxu1 %v2964_v19  ;;  %2492 = vmatprep.subr.bf16.mxu0 %v2966_v24 }
 0x33c   :  { %2668 = vmatprep.subr.bf16.mxu1 %v2967_v25 }
 0x33e   :  { %2493 = vmatpush3.bf16.msra.mxu0 %v2968_v26 }
 0x33f   :  { %2669 = vmatpush3.bf16.msra.mxu1 %v2967_v25  ;;  %2494 = vmatprep.subr.bf16.mxu0 %v2969_v27 }
 0x340   :  { %2670 = vmatprep.subr.bf16.mxu1 %v2970_v28 }
 0x342   :  { %2495 = vmatpush3.bf16.msra.mxu0 %v2971_v29 }
 0x343   :  { %2671 = vmatpush3.bf16.msra.mxu1 %v2970_v28  ;;  %2496 = vmatprep.subr.bf16.mxu0 %v2972_v30 }
 0x344   :  { %2672 = vmatprep.subr.bf16.mxu1 %v2973_v31 }
 0x346   :  { %2497 = vmatpush3.bf16.msra.mxu0 %v2974_v32 }
 0x347   :  { %2673 = vmatpush3.bf16.msra.mxu1 %v2973_v31  ;;  %2498 = vmatprep.subr.bf16.mxu0 %v2975_v33 }
 0x348   :  { %2674 = vmatprep.subr.bf16.mxu1 %v2976_v34 }
 0x34a   :  { %2499 = vmatpush3.bf16.msra.mxu0 %v2977_v35 }
 0x34b   :  { %2675 = vmatpush3.bf16.msra.mxu1 %v2976_v34  ;;  %2808 = vmatprep.subr.bf16.mxu0 %v3059_v39 }
 0x34c   :  { %2832 = vmatprep.subr.bf16.mxu1 %v3059_v39 }
 0x34d   :  { %1739 = vmatmul.mubr.bf16.vlgmr.msra.gmra.mrb[28].mxu0 %v1150_v58 }
 0x34e   :  { %2677 = vmatmul.mubr.bf16.vlgmr.msra.gmra.mrb[24].mxu1 %v1159_v1  ;;  %1746 = vmatprep.mubr.bf16.mxu0 %v1158_v46 }
 0x34f   :  { %2810 = vmatpush3.bf16.msra.mxu0 %v3149_v38  ;;  %2834 = vmatpush3.bf16.msra.mxu1 %v3149_v38 }
 0x350   :  { %2811 = vmatprep.subr.bf16.mxu0 %v3059_v39  ;;  %2835 = vmatprep.subr.bf16.mxu1 %v3059_v39 }
 0x351   :  { %2747 = vmatprep.mubr.msk.f32.mxu1 %vm3060_vm0, %v3058_v0 }
 0x353   :  { %2813 = vmatpush3.bf16.msra.mxu0 %v3163_v42  ;;  %2837 = vmatpush3.bf16.msra.mxu1 %v3163_v42 }
 0x354   :  { %2814 = vmatprep.subr.bf16.mxu0 %v3059_v39  ;;  %2838 = vmatprep.subr.bf16.mxu1 %v3059_v39 }
 0x355   :  { %1747 = vmatmul.mubr.bf16.gmra.mrb[32].mxu0 %v1157_v50 }
 0x356   :  { %2712 = vmatprep.mubr.msk.f32.mxu0 %vm3060_vm0, %v3058_v0 }
 0x357   :  { %2816 = vmatpush3.bf16.msra.mxu0 %v3175_v45  ;;  %2840 = vmatpush3.bf16.msra.mxu1 %v3175_v45 }
 0x358   :  { %2817 = vmatprep.subr.bf16.mxu0 %v3059_v39  ;;  %2841 = vmatprep.subr.bf16.mxu1 %v3059_v39 }
 0x35b   :  { %2819 = vmatpush3.bf16.msra.mxu0 %v3187_v48  ;;  %2843 = vmatpush3.bf16.msra.mxu1 %v3187_v48 }
 0x35c   :  { %2820 = vmatprep.subr.bf16.mxu0 %v3059_v39  ;;  %2844 = vmatprep.subr.bf16.mxu1 %v3059_v39 }
 0x35f   :  { %2822 = vmatpush3.bf16.msra.mxu0 %v3199_v51  ;;  %2846 = vmatpush3.bf16.msra.mxu1 %v3199_v51 }
 0x360   :  { %2823 = vmatprep.subr.bf16.mxu0 %v3059_v39  ;;  %2847 = vmatprep.subr.bf16.mxu1 %v3059_v39 }
 0x363   :  { %2825 = vmatpush3.bf16.msra.mxu0 %v3211_v54  ;;  %2849 = vmatpush3.bf16.msra.mxu1 %v3211_v54 }
 0x364   :  { %2826 = vmatprep.subr.bf16.mxu0 %v3059_v39  ;;  %2850 = vmatprep.subr.bf16.mxu1 %v3059_v39 }
 0x367   :  { %2828 = vmatpush3.bf16.msra.mxu0 %v3223_v57  ;;  %2852 = vmatpush3.bf16.msra.mxu1 %v3223_v57 }
 0x368   :  { %2829 = vmatprep.subr.bf16.mxu0 %v3059_v39  ;;  %2853 = vmatprep.subr.bf16.mxu1 %v3059_v39 }
 0x36b   :  { %2831 = vmatpush3.bf16.msra.mxu0 %v3235_v60  ;;  %2855 = vmatpush3.bf16.msra.mxu1 %v3235_v60 }
 0x36c   :  { %2750 = vmatprep.subr.mxu0 %v3058_v0  ;;  %2755 = vmatprep.subr.mxu1 %v3058_v0 }
 0x400   :  { %v2444_v38 = vpop.f32.mrb[20].mxu0 }
 0x401   :  { %v2472_v42 = vpop.f32.mrb[16].mxu1  ;;  %v2445_v45 = vpop.f32.mrb[21].mxu0 }
 0x402   :  { %v2473_v48 = vpop.f32.mrb[17].mxu1  ;;  %v2446_v51 = vadd.f32 %v2445_v45, %v2444_v38  ;;  %v2447_v52 = vpop.f32.mrb[22].mxu0 }
 0x403   :  { %v2474_v54 = vadd.f32 %v2473_v48, %v2472_v42  ;;  %v2475_v57 = vpop.f32.mrb[18].mxu1  ;;  %v2448_v53 = vpop.f32.mrb[23].mxu0 }
 0x404   :  { %v2476_v55 = vpop.f32.mrb[19].mxu1  ;;  %v2449_v39 = vadd.f32 %v2448_v53, %v2447_v52 }
 0x405   :  { %v1692_v56 = vadd.f32 %v2474_v54, %v2446_v51  ;;  %v2477_v59 = vadd.f32 %v2476_v55, %v2475_v57 }
 0x407   :  { %v1695_v61 = vadd.f32 %v2477_v59, %v2449_v39 }
 0x408   :  { %v2450_v62 = vpop.f32.mrb[24].mxu0 }
 0x409   :  { %v2478_v60 = vpop.f32.mrb[20].mxu1  ;;  %v2451_v63 = vpop.f32.mrb[25].mxu0 }
 0x40a   :  { %v2479_v2 = vpop.f32.mrb[21].mxu1  ;;  %v2452_v3 = vadd.f32 %v2451_v63, %v2450_v62  ;;  %v2453_v5 = vpop.f32.mrb[26].mxu0 }
 0x40b   :  { %v2480_v4 = vadd.f32 %v2479_v2, %v2478_v60  ;;  %v2481_v6 = vpop.f32.mrb[22].mxu1  ;;  %v2454_v7 = vpop.f32.mrb[27].mxu0 }
 0x40c   :  { %v2482_v8 = vpop.f32.mrb[23].mxu1  ;;  %v2455_v10 = vadd.f32 %v2454_v7, %v2453_v5  ;;  %v1116_v7 = vld [vmem:[%s3361_s3 + $0x2] sm:$0x1] }
 0x40d   :  { %v1700_v9 = vadd.f32 %v2480_v4, %v2452_v3  ;;  %v2483_v11 = vadd.f32 %v2482_v8, %v2481_v6 }
 0x40f   :  { %v1703_v12 = vadd.f32 %v2483_v11, %v2455_v10 }
 0x420   :  { %v2500_v13 = vpop.f32.mrb[28].mxu0 }
 0x421   :  { %v2678_v14 = vpop.f32.mrb[24].mxu1  ;;  %v2501_v15 = vpop.f32.mrb[29].mxu0 }
 0x422   :  { %v1789_v16 = vpop.f32.mrb[25].mxu1  ;;  %v2502_v17 = vadd.f32 %v2501_v15, %v2500_v13  ;;  %v2503_v19 = vpop.f32.mrb[30].mxu0 }
 0x423   :  { %v2679_v20 = vpop.f32.mrb[26].mxu1  ;;  %v2504_v22 = vpop.f32.mrb[31].mxu0 }
 0x424   :  { %v1792_v23 = vpop.f32.mrb[27].mxu1  ;;  %v1741_v24 = vadd.f32 %v2502_v17, %v1692_v56  ;;  %v2505_v25 = vadd.f32 %v2504_v22, %v2503_v19 }
 0x426   :  { %v1790_v26 = vadd.f32 %v1789_v16, %v1741_v24  ;;  %v1744_v27 = vadd.f32 %v2505_v25, %v1695_v61 }
 0x428   :  { %v1793_v28 = vadd.f32 %v1792_v23, %v1744_v27  ;;  %v2506_v29 = vpop.f32.mrb[32].mxu0  ;;  %v1813_v40 = vmul.f32 %v1790_v26, %v1790_v26 }
 0x429   :  { %v2507_v30 = vpop.f32.mrb[33].mxu0 }
 0x42a   :  { %v2508_v31 = vadd.f32 %v2507_v30, %v2506_v29  ;;  %v2509_v32 = vpop.f32.mrb[34].mxu0  ;;  %v1814_v34 = vmul.f32 %v1793_v28, %v1793_v28  ;;  %v1804_v43 = vadd.f32 %v1793_v28, %v1790_v26 }
 0x42b   :  { %v2510_v33 = vpop.f32.mrb[35].mxu0 }
 0x42c   :  { %v1749_v35 = vadd.f32 %v2508_v31, %v1700_v9  ;;  %v2511_v36 = vadd.f32 %v2510_v33, %v2509_v32  ;;  %v1817_v41 = vadd.f32 %v1814_v34, %v1813_v40 }
 0x42e   :  { %v1798_v44 = vadd.f32 %v2678_v14, %v1749_v35  ;;  %v1752_v37 = vadd.f32 %v2511_v36, %v1703_v12 }
 0x430   :  { %v1805_v58 = vadd.f32 %v1804_v43, %v1798_v44  ;;  %v1815_v1 = vmul.f32 %v1798_v44, %v1798_v44  ;;  %v1801_v46 = vadd.f32 %v2679_v20, %v1752_v37 }
 0x432   :  { %v1818_v47 = vadd.f32 %v1817_v41, %v1815_v1  ;;  %v1806_v49 = vadd.f32 %v1805_v58, %v1801_v46  ;;  %v1816_v50 = vmul.f32 %v1801_v46, %v1801_v46 }
 0x434   :  { %v1807_v38 = vrot.slane %v1806_v49, 4  ;;  %v1819_v42 = vadd.f32 %v1818_v47, %v1816_v50 }
 0x436   :  { %v1808_v45 = vadd.f32 %v1807_v38, %v1806_v49  ;;  %v1820_v48 = vrot.slane %v1819_v42, 4 }
 0x438   :  { %v1809_v51 = vrot.slane %v1808_v45, 2  ;;  %v1821_v54 = vadd.f32 %v1820_v48, %v1819_v42 }
 0x43a   :  { %v1810_v52 = vadd.f32 %v1809_v51, %v1808_v45  ;;  %v1822_v57 = vrot.slane %v1821_v54, 2 }
 0x43c   :  { %v1811_v53 = vrot.slane %v1810_v52, 1  ;;  %v1823_v55 = vadd.f32 %v1822_v57, %v1821_v54 }
 0x43e   :  { %v1812_v56 = vadd.f32 %v1811_v53, %v1810_v52  ;;  %v1824_v39 = vrot.slane %v1823_v55, 1 }
 0x440   :  { %2713 = vmatmul.mubr.f32.vlgmr.msra.gmra.mrb[36].mxu0 %v1812_v56  ;;  %v1825_v59 = vadd.f32 %v1824_v39, %v1823_v55 }
 0x441   :  { %2751 = vmatpush3.msra.mxu0 %v3272_v18  ;;  %2752 = vmatprep.mubr.msk.f32.mxu0 %vm3060_vm0, %v3058_v0 }
 0x442   :  { %2748 = vmatmul.mubr.f32.vlgmr.msra.gmra.mrb[28].mxu1 %v1825_v59 }
 0x443   :  { %2756 = vmatpush3.msra.mxu1 %v3272_v18  ;;  %2757 = vmatprep.mubr.msk.f32.mxu1 %vm3060_vm0, %v3058_v0  ;;  %v1117_v0 = vld [vmem:[%s3361_s3 + $0x3] sm:$0x1]  ;;  %s2167_s3 = sshll.u32 %s3061_s17, 4  ;;  %s2168_s3 = int_to_ptr.vmem [resolvable:$true] %s2167_s3 }
 0x444   :  { %s3026_s18 = scalar_lea.vmem %s2168_s3, 512  ;;  %p3031_p3 = scmp.lt.s32.totalorder %s2168_s3, %s2168_s3 }
 0x445   :  { %p3027_p2 = scmp.ne.s32.totalorder %s2168_s3, %s3026_s18  ;;  %p3032_p4 = scmp.lt.s32.totalorder %s3026_s18, %s3026_s18 }
 0x447   :  { %p3033_p5 = por %p3032_p4, %p3031_p3 }
 0x449   :  { %p3034_p6 = pnand %p3033_p5, %p3027_p2 }
 0x513   :  { %v1908_v61 = vpop.f32.mrb[36].mxu0 }
 0x514   :  { %v1912_v62 = vmul.f32 0.001953125, %v1908_v61  ;;  %v2714_v60 = vpop.f32.mrb[37].mxu0 }
 0x515   :  { %v1979_v63 = vpop.f32.mrb[28].mxu1 }
 0x516   :  { %v1984_v2 = vmul.f32 %v1912_v62, %v1912_v62  ;;  %v1983_v3 = vmul.f32 0.001953125, %v1979_v63  ;;  %v2749_v4 = vpop.f32.mrb[29].mxu1 }
 0x518   :  { %v1985_v5 = vsub.f32 %v1983_v3, %v1984_v2 }
 0x51a   :  { %v1986_v6 = vadd.f32 1e-05, %v1985_v5 }
 0x51c   :  { %2980 = vrsqrt.f32 %v1986_v6 }
 0x526   :  { %v2981_v8 = vpop.eup %2980 }
 0x527   :  { %v1988_v9 = vmul.f32 %v2981_v8, %v1116_v7 }
 0x529   :  { %2753 = vmatmul.mubr.msk.f32.vlgmr.msra.gmra.mrb[38].mxu0 %vm945_vm1, %v1988_v9  ;;  %v1989_v18 = vmul.f32 %v1988_v9, %v1912_v62 }
 0x52b   :  { %v1990_v10 = vsub.f32 %v1117_v0, %v1989_v18 }
 0x52d   :  { %2758 = vmatmul.mubr.msk.f32.vlgmr.msra.gmra.mrb[30].mxu1 %vm945_vm1, %v1990_v10 }
 0x5fc   :  { %v2061_v11 = vpop.f32.mrb[38].mxu0 }
 0x5fd   :  { %v2141_v12 = vrot.slane %v2061_v11, %v3284_v21  ;;  %v2754_v13 = vpop.f32.mrb[39].mxu0 }
 0x5ff   :  { %v2142_v14 = vmul.f32 %v2141_v12, %v1790_v26  ;;  %v2143_v16 = vmul.f32 %v2141_v12, %v1793_v28  ;;  %v2144_v17 = vmul.f32 %v2141_v12, %v1798_v44  ;;  %v2145_v19 = vmul.f32 %v2141_v12, %v1801_v46 }
 0x600   :  { %v2134_v15 = vpop.f32.mrb[30].mxu1 }
 0x601   :  { %v2149_v20 = vrot.slane %v2134_v15, %v3284_v21  ;;  %v2759_v22 = vpop.f32.mrb[31].mxu1 }
 0x603   :  { %v2150_v23 = vadd.f32 %v2149_v20, %v2142_v14  ;;  %v2151_v24 = vadd.f32 %v2149_v20, %v2143_v16  ;;  %v2152_v25 = vadd.f32 %v2149_v20, %v2144_v17  ;;  %v2153_v27 = vadd.f32 %v2149_v20, %v2145_v19 }
 0x605   :  { %v2154_v29 = vmax.f32 %v2150_v23, 0.0  ;;  %v2155_v30 = vmax.f32 %v2151_v24, 0.0  ;;  %v2156_v31 = vmax.f32 %v2152_v25, 0.0  ;;  %v2157_v32 = vmax.f32 %v2153_v27, 0.0 }
 0x607   :  { %2158 = vst [vmem:[#allocation9] sm:$0xff] %v2154_v29  ;;  %2159 = vst [vmem:[#allocation9 + $0x8] sm:$0xff] %v2155_v30 }
 0x608   :  { %2160 = vst [vmem:[#allocation9 + $0x10] sm:$0xff] %v2156_v31  ;;  %2161 = vst [vmem:[#allocation9 + $0x18] sm:$0xff] %v2157_v32 }
 0x609   :  { %3037 = shalt.err (!%p3034_p6)
}
 0x60a   :  { %s3038_s1 = scalar_lea.hbm %s3364_s6, 512 }
 0x60b   :  { %p3039_p7 = scmp.ne.s32.totalorder %s3364_s6, %s3038_s1  ;;  %p3042_p8 = scmp.lt.u32.totalorder %s3038_s1, %s3364_s6 }
 0x60d   :  { %p3044_p9 = pnand %p3042_p8, %p3039_p7 }
 0x60f   :  { %3047 = shalt.err (!%p3044_p9)
}
 0x610   :  { %s3062_s24 = smov 128   ;;  %s3063_s25 = smov 8  }
 0x611   :  { %2173 = dma.vmem_to_hbm [thread:$0]  %s2168_s3, 512, %s3364_s6, [#allocation6], %s3062_s24, %s3062_s24, %s3063_s25  }
 0x612   :  { %3052 = dma.done.wait [#allocation6], 512  }
 0x613   :  { %3053 = vsyncadd [#allocation6], 4294966784 }
 0x614   :  { %2177 = vsyncpa [#allocation5], 1 }
 0x615   :  { %2178 = vsyncpa [#allocation8], 1 }
 0x616   :  { %2179 = vsyncpa [#allocation6], 1 }

</bundles_post_ra>
